<compile_context>
chip_gen: v5e
topology: v5e:2x2
jax: 0.10.0
libtpu: 0.0.40
codegen_flags: <defaults>
</compile_context>

<pallas_src>
import jax
import jax.numpy as jnp
from jax.experimental import pallas as pl
from jax.experimental.pallas import tpu as pltpu


# ---------------------------------------------------------------------------
# Parameters (PyTorch layout) and one-time preparation into kernel layout.
# ---------------------------------------------------------------------------
def init_params(key, input_size, hidden_size):
    conv_size = 32 * ((input_size + 8) // 9) ** 2
    k1, k2, k3, k4, k5, k6 = jax.random.split(key, 6)
    return {
        "w1": 0.1 * jax.random.normal(k1, (16, 1, 3, 3), jnp.float32),
        "b1": 0.1 * jax.random.normal(k2, (16,), jnp.float32),
        "w2": 0.1 * jax.random.normal(k3, (32, 16, 3, 3), jnp.float32),
        "b2": 0.1 * jax.random.normal(k4, (32,), jnp.float32),
        "wf": 0.1 * jax.random.normal(k5, (hidden_size, conv_size), jnp.float32),
        "bf": 0.1 * jax.random.normal(k6, (hidden_size,), jnp.float32),
    }


def prepare_params(params, input_size):
    """Fold every layout permutation into the weights (done once, not per call)."""
    P1 = (input_size - 1) // 3 + 1          # conv1 output spatial (10)
    P2 = (P1 - 1) // 3 + 1                  # conv2 output spatial (4)
    w1, b1 = params["w1"], params["b1"]     # (16,1,3,3), (16,)
    w2, b2 = params["w2"], params["b2"]     # (32,16,3,3), (32,)
    wf, bf = params["wf"], params["bf"]     # (hidden, 512), (hidden,)
    C1, C2, H = w1.shape[0], w2.shape[0], wf.shape[0]

    # conv1 as one wide block-diagonal matmul:
    #   LHS (P1, 9*P1): row p holds the 9-taps of every output column q.
    #   RHS (9*P1, C1*(P1+2)): block-diag of w1, with C1 zero lanes on each side
    #   so the output rows are already zero-padded columns for conv2's im2col.
    w1m = jnp.transpose(w1, (2, 3, 1, 0)).reshape(9, C1)        # row = 3*i + j
    bd = jnp.kron(jnp.eye(P1, dtype=w1m.dtype), w1m)            # (9*P1, C1*P1)
    w1_bd = jnp.pad(bd, ((0, 0), (C1, C1)))                     # (9*P1, C1*(P1+2))
    b1_w = jnp.pad(jnp.tile(b1, P1), (C1, C1)).reshape(1, -1)   # (1, C1*(P1+2))

    # conv2 weight with rows ordered (i, j, c_in) to match the in-kernel im2col.
    w2m = jnp.transpose(w2, (2, 3, 1, 0)).reshape(9 * C1, C2)   # (144, 32)
    b2r = b2.reshape(1, C2)

    # fc weight: permute input dim from PyTorch NCHW-flatten order (ch*16 + pos)
    # to our (pos*32 + ch) order, and pre-transpose to (512, hidden).
    wf3 = wf.reshape(H, C2, P2 * P2)                            # [n, ch, pos]
    wf_perm = jnp.transpose(wf3, (2, 1, 0)).reshape(C2 * P2 * P2, H)
    bfr = bf.reshape(1, H)

    return {"w1": w1_bd, "b1": b1_w, "w2": w2m, "b2": b2r,
            "wf": wf_perm, "bf": bfr}


# ---------------------------------------------------------------------------
# Wrapper-side input layout prep (padding + conv1 patch gather on the raw input).
# ---------------------------------------------------------------------------
def _prep_input(x_nchw):
    B, _, Hin, _ = x_nchw.shape
    P1 = (Hin - 1) // 3 + 1
    x = x_nchw[:, 0]                                    # (B, 28, 28) — C_in == 1
    xp = jnp.pad(x, ((0, 0), (1, 1), (1, 1)))           # (B, 3*P1, 3*P1)
    x5 = xp.reshape(B, P1, 3, P1, 3)                    # (B, p, i, q, j)
    x5 = jnp.transpose(x5, (0, 1, 3, 2, 4))             # (B, p, q, i, j)
    return x5.reshape(B, P1, 9 * P1).astype(jnp.float32)


# ---------------------------------------------------------------------------
# Fused forward: conv1 + ELU + conv2 (in-kernel im2col) + ELU + fc + ELU.
# ---------------------------------------------------------------------------
def downscaler_forward(x_nchw, prepped):
    B = x_nchw.shape[0]
    input_size = x_nchw.shape[-1]
    P1 = (input_size - 1) // 3 + 1
    P2 = (P1 - 1) // 3 + 1
    assert 3 * P1 == input_size + 2 and 3 * P2 == P1 + 2, "unsupported input_size"

    K1 = 9 * P1                              # 90
    K2 = prepped["w2"].shape[0]              # 144
    C1 = K2 // 9                             # 16
    C2 = prepped["b2"].shape[1]              # 32
    W1 = C1 * (P1 + 2)                       # 192 (conv1 wide output lanes)
    NPOS = P2 * P2                           # 16
    FC_K = prepped["wf"].shape[0]            # 512
    H = prepped["bf"].shape[1]               # hidden
    assert FC_K == NPOS * C2
    CW = 3 * C1                              # 48: one (3 cols x C1 ch) chunk

    def kernel(x1_ref, w1_ref, b1_ref, w2_ref, b2_ref, wf_ref, bf_ref,
               out_ref, cols2_ref, fcin_ref):
        def elu(v):
            # clamp exp arg so the untaken branch can never overflow
            return jnp.where(v > 0, v, jnp.exp(jnp.minimum(v, 0.0)) - 1.0)

        # ---- conv1 (+ ELU): (P1, 9*P1) @ (9*P1, W1) -> (P1, W1) ------------
        # lane layout: C1*(q_padded) + ch, with q_padded 0 and P1+1 exactly 0
        # (zero weight lanes + zero bias lanes -> ELU(0) == 0).
        h1w = elu(jnp.dot(x1_ref[0], w1_ref[...],
                          preferred_element_type=jnp.float32) + b1_ref[...])

        # ---- conv2 im2col, fully in VMEM: build cols2 (NPOS, 9*C1) ---------
        # cols2[P2*r + c, CW*i + C1*j + ch] = conv1-out padded (3r+i, 3c+j, ch)
        # top / bottom spatial padding rows of conv2's input -> zero chunks
        cols2_ref[0:P2, 0:CW] = jnp.zeros((P2, CW), jnp.float32)
        cols2_ref[NPOS - P2:NPOS, K2 - CW:K2] = jnp.zeros((P2, CW), jnp.float32)
        for r in range(P2):
            for i in range(3):
                ph = 3 * r + i                       # padded conv2-input row
                if ph == 0 or ph == 3 * P2 - 1:
                    continue                         # zero-filled above
                src = h1w[ph - 1:ph, :]              # (1, W1)
                for c in range(P2):
                    cols2_ref[P2 * r + c:P2 * r + c + 1, CW * i:CW * i + CW] = (
                        src[:, CW * c:CW * c + CW])

        # ---- conv2 (+ ELU): (NPOS, K2) @ (K2, C2) -> (NPOS, C2) ------------
        h2 = elu(jnp.dot(cols2_ref[...], w2_ref[...],
                         preferred_element_type=jnp.float32) + b2_ref[...])

        # ---- flatten (NPOS, C2) -> (1, FC_K) without an in-kernel reshape ---
        for pos in range(NPOS):
            fcin_ref[0:1, C2 * pos:C2 * pos + C2] = h2[pos:pos + 1, :]

        # ---- fc (+ ELU): (1, FC_K) @ (FC_K, H) -----------------------------
        y = elu(jnp.dot(fcin_ref[...], wf_ref[...],
                        preferred_element_type=jnp.float32) + bf_ref[...])
        out_ref[0] = y.astype(out_ref.dtype)

    x1 = _prep_input(x_nchw)                           # (B, P1, 9*P1)

    out3 = pl.pallas_call(
        kernel,
        out_shape=jax.ShapeDtypeStruct((B, 1, H), jnp.float32),
        grid=(B,),
        in_specs=[
            pl.BlockSpec((1, P1, K1), lambda b: (b, 0, 0)),   # per-sample input
            pl.BlockSpec((K1, W1), lambda b: (0, 0)),         # conv1 block-diag W
            pl.BlockSpec((1, W1), lambda b: (0, 0)),          # conv1 bias (wide)
            pl.BlockSpec((K2, C2), lambda b: (0, 0)),         # conv2 W
            pl.BlockSpec((1, C2), lambda b: (0, 0)),          # conv2 bias
            pl.BlockSpec((FC_K, H), lambda b: (0, 0)),        # fc W (permuted)
            pl.BlockSpec((1, H), lambda b: (0, 0)),           # fc bias
        ],
        out_specs=pl.BlockSpec((1, 1, H), lambda b: (b, 0, 0)),
        scratch_shapes=[
            pltpu.VMEM((NPOS, K2), jnp.float32),               # conv2 im2col cols
            pltpu.VMEM((1, FC_K), jnp.float32),                # flattened fc input
        ],
        compiler_params=pltpu.CompilerParams(
            dimension_semantics=("parallel",)),                # v7x: 2 TCs share B
        cost_estimate=pl.CostEstimate(
            flops=2 * B * (P1 * K1 * W1 + NPOS * K2 * C2 + FC_K * H),
            transcendentals=B * (P1 * W1 + NPOS * C2 + H),
            bytes_accessed=4 * (B * P1 * K1 + K1 * W1 + K2 * C2
                                + FC_K * H + B * H),
        ),
    )(x1, prepped["w1"], prepped["b1"], prepped["w2"], prepped["b2"],
      prepped["wf"], prepped["bf"])

    return out3.reshape(B, H)


# ---------------------------------------------------------------------------
# Pure-JAX reference (correctness check only).
# ---------------------------------------------------------------------------
def _ref_forward(x_nchw, params):
    h = x_nchw
    for w, b in ((params["w1"], params["b1"]), (params["w2"], params["b2"])):
        h = jax.lax.conv_general_dilated(
            h, w, window_strides=(3, 3), padding=((1, 1), (1, 1)),
            dimension_numbers=("NCHW", "OIHW", "NCHW"),
            precision=jax.lax.Precision.HIGHEST)
        h = jax.nn.elu(h + b[None, :, None, None])
    h = h.reshape(h.shape[0], -1)
    y = jnp.dot(h, params["wf"].T, precision=jax.lax.Precision.HIGHEST) + params["bf"]
    return jax.nn.elu(y)


if __name__ == "__main__":
    B, input_size, hidden_size = 2, 28, 32
    key = jax.random.PRNGKey(0)
    kx, kp = jax.random.split(key)
    x = jax.random.normal(kx, (B, 1, input_size, input_size), jnp.float32)
    params = init_params(kp, input_size, hidden_size)
    prepped = prepare_params(params, input_size)      # one-time weight folding

    fwd = jax.jit(downscaler_forward)
    out = jax.block_until_ready(fwd(x, prepped))

    assert out.shape == (B, hidden_size), out.shape
    ref = _ref_forward(x, params)
    err = float(jnp.max(jnp.abs(out - ref)))
    assert jnp.allclose(out, ref, atol=1e-4, rtol=1e-4), f"mismatch vs reference: {err}"

    print("KERNEL_OK")
</pallas_src>

<mosaic_0001>
module attributes {stable_mosaic.version = 11 : i64} {
  func.func @kernel(%arg0: i32, %arg1: memref<1x10x90xf32, #tpu.memory_space<vmem>>, %arg2: memref<90x192xf32, #tpu.memory_space<vmem>>, %arg3: memref<1x192xf32, #tpu.memory_space<vmem>>, %arg4: memref<144x32xf32, #tpu.memory_space<vmem>>, %arg5: memref<1x32xf32, #tpu.memory_space<vmem>>, %arg6: memref<512x32xf32, #tpu.memory_space<vmem>>, %arg7: memref<1x32xf32, #tpu.memory_space<vmem>>, %arg8: memref<1x1x32xf32, #tpu.memory_space<vmem>>, %arg9: memref<16x144xf32, #tpu.memory_space<vmem>>, %arg10: memref<1x512xf32, #tpu.memory_space<vmem>>) attributes {dimension_semantics = [#tpu.dimension_semantics<parallel>], iteration_bounds = array<i64: 2>, scalar_prefetch = 0 : i64, scratch_operands = 2 : i64, tpu.core_type = #tpu.core_type<tc>, window_params = [{transform_indices = @transform_0, window_bounds = array<i64: 1, 10, 90>}, {pipeline_mode = #tpu.pipeline_mode<synchronous>, transform_indices = @transform_1, window_bounds = array<i64: 90, 192>}, {pipeline_mode = #tpu.pipeline_mode<synchronous>, transform_indices = @transform_2, window_bounds = array<i64: 1, 192>}, {pipeline_mode = #tpu.pipeline_mode<synchronous>, transform_indices = @transform_3, window_bounds = array<i64: 144, 32>}, {pipeline_mode = #tpu.pipeline_mode<synchronous>, transform_indices = @transform_4, window_bounds = array<i64: 1, 32>}, {pipeline_mode = #tpu.pipeline_mode<synchronous>, transform_indices = @transform_5, window_bounds = array<i64: 512, 32>}, {pipeline_mode = #tpu.pipeline_mode<synchronous>, transform_indices = @transform_6, window_bounds = array<i64: 1, 32>}, {transform_indices = @transform_7, window_bounds = array<i64: 1, 1, 32>}]} {
    %c0 = arith.constant 0 : index
    %c0_0 = arith.constant 0 : index
    %c0_1 = arith.constant 0 : index
    %0 = vector.load %arg1[%c0, %c0_0, %c0_1] : memref<1x10x90xf32, #tpu.memory_space<vmem>>, vector<1x10x90xf32>
    %1 = vector.shape_cast %0 : vector<1x10x90xf32> to vector<10x90xf32>
    %c0_2 = arith.constant 0 : index
    %c0_3 = arith.constant 0 : index
    %2 = vector.load %arg2[%c0_2, %c0_3] : memref<90x192xf32, #tpu.memory_space<vmem>>, vector<90x192xf32>
    %cst = arith.constant dense<0.000000e+00> : vector<10x192xf32>
    %3 = tpu.matmul %1, %2, %cst {dimension_numbers = #tpu.dot_dimension_numbers<[1], [0], [0], [1], [0, 0, 1, 1], [], []>} : vector<10x90xf32>, vector<90x192xf32>, vector<10x192xf32> -> vector<10x192xf32>
    %c0_4 = arith.constant 0 : index
    %c0_5 = arith.constant 0 : index
    %4 = vector.load %arg3[%c0_4, %c0_5] : memref<1x192xf32, #tpu.memory_space<vmem>>, vector<1x192xf32>
    %5 = vector.broadcast %4 : vector<1x192xf32> to vector<10x192xf32>
    %6 = arith.addf %3, %5 : vector<10x192xf32>
    %cst_6 = arith.constant 0.000000e+00 : f32
    %7 = vector.broadcast %cst_6 : f32 to vector<10x192xf32>
    %8 = arith.cmpf ogt, %6, %7 : vector<10x192xf32>
    %cst_7 = arith.constant 0.000000e+00 : f32
    %9 = vector.broadcast %cst_7 : f32 to vector<10x192xf32>
    %10 = arith.minimumf %6, %9 : vector<10x192xf32>
    %11 = math.exp %10 : vector<10x192xf32>
    %cst_8 = arith.constant 1.000000e+00 : f32
    %12 = vector.broadcast %cst_8 : f32 to vector<10x192xf32>
    %13 = arith.subf %11, %12 : vector<10x192xf32>
    %14 = arith.select %8, %6, %13 : vector<10x192xi1>, vector<10x192xf32>
    %cst_9 = arith.constant 0.000000e+00 : f32
    %15 = vector.broadcast %cst_9 : f32 to vector<4x48xf32>
    %c0_10 = arith.constant 0 : index
    %c0_11 = arith.constant 0 : index
    %16 = vector.load %arg9[%c0_10, %c0_11] : memref<16x144xf32, #tpu.memory_space<vmem>>, vector<4x48xf32>
    tpu.vector_store %arg9[%c0_10, %c0_11], %15 {strides = array<i32>} : memref<16x144xf32, #tpu.memory_space<vmem>>, vector<4x48xf32>,
    %cst_12 = arith.constant 0.000000e+00 : f32
    %17 = vector.broadcast %cst_12 : f32 to vector<4x48xf32>
    %c12 = arith.constant 12 : index
    %c96 = arith.constant 96 : index
    %18 = vector.load %arg9[%c12, %c96] : memref<16x144xf32, #tpu.memory_space<vmem>>, vector<4x48xf32>
    tpu.vector_store %arg9[%c12, %c96], %17 {strides = array<i32>} : memref<16x144xf32, #tpu.memory_space<vmem>>, vector<4x48xf32>,
    %19 = vector.extract_strided_slice %14 {offsets = [0, 0], sizes = [1, 192], strides = [1, 1]} : vector<10x192xf32> to vector<1x192xf32>
    %20 = vector.extract_strided_slice %19 {offsets = [0, 0], sizes = [1, 48], strides = [1, 1]} : vector<1x192xf32> to vector<1x48xf32>
    %c0_13 = arith.constant 0 : index
    %c48 = arith.constant 48 : index
    %21 = vector.load %arg9[%c0_13, %c48] : memref<16x144xf32, #tpu.memory_space<vmem>>, vector<1x48xf32>
    tpu.vector_store %arg9[%c0_13, %c48], %20 {strides = array<i32>} : memref<16x144xf32, #tpu.memory_space<vmem>>, vector<1x48xf32>,
    %22 = vector.extract_strided_slice %19 {offsets = [0, 48], sizes = [1, 48], strides = [1, 1]} : vector<1x192xf32> to vector<1x48xf32>
    %c1 = arith.constant 1 : index
    %c48_14 = arith.constant 48 : index
    %23 = vector.load %arg9[%c1, %c48_14] : memref<16x144xf32, #tpu.memory_space<vmem>>, vector<1x48xf32>
    tpu.vector_store %arg9[%c1, %c48_14], %22 {strides = array<i32>} : memref<16x144xf32, #tpu.memory_space<vmem>>, vector<1x48xf32>,
    %24 = vector.extract_strided_slice %19 {offsets = [0, 96], sizes = [1, 48], strides = [1, 1]} : vector<1x192xf32> to vector<1x48xf32>
    %c2 = arith.constant 2 : index
    %c48_15 = arith.constant 48 : index
    %25 = vector.load %arg9[%c2, %c48_15] : memref<16x144xf32, #tpu.memory_space<vmem>>, vector<1x48xf32>
    tpu.vector_store %arg9[%c2, %c48_15], %24 {strides = array<i32>} : memref<16x144xf32, #tpu.memory_space<vmem>>, vector<1x48xf32>,
    %26 = vector.extract_strided_slice %19 {offsets = [0, 144], sizes = [1, 48], strides = [1, 1]} : vector<1x192xf32> to vector<1x48xf32>
    %c3 = arith.constant 3 : index
    %c48_16 = arith.constant 48 : index
    %27 = vector.load %arg9[%c3, %c48_16] : memref<16x144xf32, #tpu.memory_space<vmem>>, vector<1x48xf32>
    tpu.vector_store %arg9[%c3, %c48_16], %26 {strides = array<i32>} : memref<16x144xf32, #tpu.memory_space<vmem>>, vector<1x48xf32>,
    %28 = vector.extract_strided_slice %14 {offsets = [1, 0], sizes = [1, 192], strides = [1, 1]} : vector<10x192xf32> to vector<1x192xf32>
    %29 = vector.extract_strided_slice %28 {offsets = [0, 0], sizes = [1, 48], strides = [1, 1]} : vector<1x192xf32> to vector<1x48xf32>
    %c0_17 = arith.constant 0 : index
    %c96_18 = arith.constant 96 : index
    %30 = vector.load %arg9[%c0_17, %c96_18] : memref<16x144xf32, #tpu.memory_space<vmem>>, vector<1x48xf32>
    tpu.vector_store %arg9[%c0_17, %c96_18], %29 {strides = array<i32>} : memref<16x144xf32, #tpu.memory_space<vmem>>, vector<1x48xf32>,
    %31 = vector.extract_strided_slice %28 {offsets = [0, 48], sizes = [1, 48], strides = [1, 1]} : vector<1x192xf32> to vector<1x48xf32>
    %c1_19 = arith.constant 1 : index
    %c96_20 = arith.constant 96 : index
    %32 = vector.load %arg9[%c1_19, %c96_20] : memref<16x144xf32, #tpu.memory_space<vmem>>, vector<1x48xf32>
    tpu.vector_store %arg9[%c1_19, %c96_20], %31 {strides = array<i32>} : memref<16x144xf32, #tpu.memory_space<vmem>>, vector<1x48xf32>,
    %33 = vector.extract_strided_slice %28 {offsets = [0, 96], sizes = [1, 48], strides = [1, 1]} : vector<1x192xf32> to vector<1x48xf32>
    %c2_21 = arith.constant 2 : index
    %c96_22 = arith.constant 96 : index
    %34 = vector.load %arg9[%c2_21, %c96_22] : memref<16x144xf32, #tpu.memory_space<vmem>>, vector<1x48xf32>
    tpu.vector_store %arg9[%c2_21, %c96_22], %33 {strides = array<i32>} : memref<16x144xf32, #tpu.memory_space<vmem>>, vector<1x48xf32>,
    %35 = vector.extract_strided_slice %28 {offsets = [0, 144], sizes = [1, 48], strides = [1, 1]} : vector<1x192xf32> to vector<1x48xf32>
    %c3_23 = arith.constant 3 : index
    %c96_24 = arith.constant 96 : index
    %36 = vector.load %arg9[%c3_23, %c96_24] : memref<16x144xf32, #tpu.memory_space<vmem>>, vector<1x48xf32>
    tpu.vector_store %arg9[%c3_23, %c96_24], %35 {strides = array<i32>} : memref<16x144xf32, #tpu.memory_space<vmem>>, vector<1x48xf32>,
    %37 = vector.extract_strided_slice %14 {offsets = [2, 0], sizes = [1, 192], strides = [1, 1]} : vector<10x192xf32> to vector<1x192xf32>
    %38 = vector.extract_strided_slice %37 {offsets = [0, 0], sizes = [1, 48], strides = [1, 1]} : vector<1x192xf32> to vector<1x48xf32>
    %c4 = arith.constant 4 : index
    %c0_25 = arith.constant 0 : index
    %39 = vector.load %arg9[%c4, %c0_25] : memref<16x144xf32, #tpu.memory_space<vmem>>, vector<1x48xf32>
    tpu.vector_store %arg9[%c4, %c0_25], %38 {strides = array<i32>} : memref<16x144xf32, #tpu.memory_space<vmem>>, vector<1x48xf32>,
    %40 = vector.extract_strided_slice %37 {offsets = [0, 48], sizes = [1, 48], strides = [1, 1]} : vector<1x192xf32> to vector<1x48xf32>
    %c5 = arith.constant 5 : index
    %c0_26 = arith.constant 0 : index
    %41 = vector.load %arg9[%c5, %c0_26] : memref<16x144xf32, #tpu.memory_space<vmem>>, vector<1x48xf32>
    tpu.vector_store %arg9[%c5, %c0_26], %40 {strides = array<i32>} : memref<16x144xf32, #tpu.memory_space<vmem>>, vector<1x48xf32>,
    %42 = vector.extract_strided_slice %37 {offsets = [0, 96], sizes = [1, 48], strides = [1, 1]} : vector<1x192xf32> to vector<1x48xf32>
    %c6 = arith.constant 6 : index
    %c0_27 = arith.constant 0 : index
    %43 = vector.load %arg9[%c6, %c0_27] : memref<16x144xf32, #tpu.memory_space<vmem>>, vector<1x48xf32>
    tpu.vector_store %arg9[%c6, %c0_27], %42 {strides = array<i32>} : memref<16x144xf32, #tpu.memory_space<vmem>>, vector<1x48xf32>,
    %44 = vector.extract_strided_slice %37 {offsets = [0, 144], sizes = [1, 48], strides = [1, 1]} : vector<1x192xf32> to vector<1x48xf32>
    %c7 = arith.constant 7 : index
    %c0_28 = arith.constant 0 : index
    %45 = vector.load %arg9[%c7, %c0_28] : memref<16x144xf32, #tpu.memory_space<vmem>>, vector<1x48xf32>
    tpu.vector_store %arg9[%c7, %c0_28], %44 {strides = array<i32>} : memref<16x144xf32, #tpu.memory_space<vmem>>, vector<1x48xf32>,
    %46 = vector.extract_strided_slice %14 {offsets = [3, 0], sizes = [1, 192], strides = [1, 1]} : vector<10x192xf32> to vector<1x192xf32>
    %47 = vector.extract_strided_slice %46 {offsets = [0, 0], sizes = [1, 48], strides = [1, 1]} : vector<1x192xf32> to vector<1x48xf32>
    %c4_29 = arith.constant 4 : index
    %c48_30 = arith.constant 48 : index
    %48 = vector.load %arg9[%c4_29, %c48_30] : memref<16x144xf32, #tpu.memory_space<vmem>>, vector<1x48xf32>
    tpu.vector_store %arg9[%c4_29, %c48_30], %47 {strides = array<i32>} : memref<16x144xf32, #tpu.memory_space<vmem>>, vector<1x48xf32>,
    %49 = vector.extract_strided_slice %46 {offsets = [0, 48], sizes = [1, 48], strides = [1, 1]} : vector<1x192xf32> to vector<1x48xf32>
    %c5_31 = arith.constant 5 : index
    %c48_32 = arith.constant 48 : index
    %50 = vector.load %arg9[%c5_31, %c48_32] : memref<16x144xf32, #tpu.memory_space<vmem>>, vector<1x48xf32>
    tpu.vector_store %arg9[%c5_31, %c48_32], %49 {strides = array<i32>} : memref<16x144xf32, #tpu.memory_space<vmem>>, vector<1x48xf32>,
    %51 = vector.extract_strided_slice %46 {offsets = [0, 96], sizes = [1, 48], strides = [1, 1]} : vector<1x192xf32> to vector<1x48xf32>
    %c6_33 = arith.constant 6 : index
    %c48_34 = arith.constant 48 : index
    %52 = vector.load %arg9[%c6_33, %c48_34] : memref<16x144xf32, #tpu.memory_space<vmem>>, vector<1x48xf32>
    tpu.vector_store %arg9[%c6_33, %c48_34], %51 {strides = array<i32>} : memref<16x144xf32, #tpu.memory_space<vmem>>, vector<1x48xf32>,
    %53 = vector.extract_strided_slice %46 {offsets = [0, 144], sizes = [1, 48], strides = [1, 1]} : vector<1x192xf32> to vector<1x48xf32>
    %c7_35 = arith.constant 7 : index
    %c48_36 = arith.constant 48 : index
    %54 = vector.load %arg9[%c7_35, %c48_36] : memref<16x144xf32, #tpu.memory_space<vmem>>, vector<1x48xf32>
    tpu.vector_store %arg9[%c7_35, %c48_36], %53 {strides = array<i32>} : memref<16x144xf32, #tpu.memory_space<vmem>>, vector<1x48xf32>,
    %55 = vector.extract_strided_slice %14 {offsets = [4, 0], sizes = [1, 192], strides = [1, 1]} : vector<10x192xf32> to vector<1x192xf32>
    %56 = vector.extract_strided_slice %55 {offsets = [0, 0], sizes = [1, 48], strides = [1, 1]} : vector<1x192xf32> to vector<1x48xf32>
    %c4_37 = arith.constant 4 : index
    %c96_38 = arith.constant 96 : index
    %57 = vector.load %arg9[%c4_37, %c96_38] : memref<16x144xf32, #tpu.memory_space<vmem>>, vector<1x48xf32>
    tpu.vector_store %arg9[%c4_37, %c96_38], %56 {strides = array<i32>} : memref<16x144xf32, #tpu.memory_space<vmem>>, vector<1x48xf32>,
    %58 = vector.extract_strided_slice %55 {offsets = [0, 48], sizes = [1, 48], strides = [1, 1]} : vector<1x192xf32> to vector<1x48xf32>
    %c5_39 = arith.constant 5 : index
    %c96_40 = arith.constant 96 : index
    %59 = vector.load %arg9[%c5_39, %c96_40] : memref<16x144xf32, #tpu.memory_space<vmem>>, vector<1x48xf32>
    tpu.vector_store %arg9[%c5_39, %c96_40], %58 {strides = array<i32>} : memref<16x144xf32, #tpu.memory_space<vmem>>, vector<1x48xf32>,
    %60 = vector.extract_strided_slice %55 {offsets = [0, 96], sizes = [1, 48], strides = [1, 1]} : vector<1x192xf32> to vector<1x48xf32>
    %c6_41 = arith.constant 6 : index
    %c96_42 = arith.constant 96 : index
    %61 = vector.load %arg9[%c6_41, %c96_42] : memref<16x144xf32, #tpu.memory_space<vmem>>, vector<1x48xf32>
    tpu.vector_store %arg9[%c6_41, %c96_42], %60 {strides = array<i32>} : memref<16x144xf32, #tpu.memory_space<vmem>>, vector<1x48xf32>,
    %62 = vector.extract_strided_slice %55 {offsets = [0, 144], sizes = [1, 48], strides = [1, 1]} : vector<1x192xf32> to vector<1x48xf32>
    %c7_43 = arith.constant 7 : index
    %c96_44 = arith.constant 96 : index
    %63 = vector.load %arg9[%c7_43, %c96_44] : memref<16x144xf32, #tpu.memory_space<vmem>>, vector<1x48xf32>
    tpu.vector_store %arg9[%c7_43, %c96_44], %62 {strides = array<i32>} : memref<16x144xf32, #tpu.memory_space<vmem>>, vector<1x48xf32>,
    %64 = vector.extract_strided_slice %14 {offsets = [5, 0], sizes = [1, 192], strides = [1, 1]} : vector<10x192xf32> to vector<1x192xf32>
    %65 = vector.extract_strided_slice %64 {offsets = [0, 0], sizes = [1, 48], strides = [1, 1]} : vector<1x192xf32> to vector<1x48xf32>
    %c8 = arith.constant 8 : index
    %c0_45 = arith.constant 0 : index
    %66 = vector.load %arg9[%c8, %c0_45] : memref<16x144xf32, #tpu.memory_space<vmem>>, vector<1x48xf32>
    tpu.vector_store %arg9[%c8, %c0_45], %65 {strides = array<i32>} : memref<16x144xf32, #tpu.memory_space<vmem>>, vector<1x48xf32>,
    %67 = vector.extract_strided_slice %64 {offsets = [0, 48], sizes = [1, 48], strides = [1, 1]} : vector<1x192xf32> to vector<1x48xf32>
    %c9 = arith.constant 9 : index
    %c0_46 = arith.constant 0 : index
    %68 = vector.load %arg9[%c9, %c0_46] : memref<16x144xf32, #tpu.memory_space<vmem>>, vector<1x48xf32>
    tpu.vector_store %arg9[%c9, %c0_46], %67 {strides = array<i32>} : memref<16x144xf32, #tpu.memory_space<vmem>>, vector<1x48xf32>,
    %69 = vector.extract_strided_slice %64 {offsets = [0, 96], sizes = [1, 48], strides = [1, 1]} : vector<1x192xf32> to vector<1x48xf32>
    %c10 = arith.constant 10 : index
    %c0_47 = arith.constant 0 : index
    %70 = vector.load %arg9[%c10, %c0_47] : memref<16x144xf32, #tpu.memory_space<vmem>>, vector<1x48xf32>
    tpu.vector_store %arg9[%c10, %c0_47], %69 {strides = array<i32>} : memref<16x144xf32, #tpu.memory_space<vmem>>, vector<1x48xf32>,
    %71 = vector.extract_strided_slice %64 {offsets = [0, 144], sizes = [1, 48], strides = [1, 1]} : vector<1x192xf32> to vector<1x48xf32>
    %c11 = arith.constant 11 : index
    %c0_48 = arith.constant 0 : index
    %72 = vector.load %arg9[%c11, %c0_48] : memref<16x144xf32, #tpu.memory_space<vmem>>, vector<1x48xf32>
    tpu.vector_store %arg9[%c11, %c0_48], %71 {strides = array<i32>} : memref<16x144xf32, #tpu.memory_space<vmem>>, vector<1x48xf32>,
    %73 = vector.extract_strided_slice %14 {offsets = [6, 0], sizes = [1, 192], strides = [1, 1]} : vector<10x192xf32> to vector<1x192xf32>
    %74 = vector.extract_strided_slice %73 {offsets = [0, 0], sizes = [1, 48], strides = [1, 1]} : vector<1x192xf32> to vector<1x48xf32>
    %c8_49 = arith.constant 8 : index
    %c48_50 = arith.constant 48 : index
    %75 = vector.load %arg9[%c8_49, %c48_50] : memref<16x144xf32, #tpu.memory_space<vmem>>, vector<1x48xf32>
    tpu.vector_store %arg9[%c8_49, %c48_50], %74 {strides = array<i32>} : memref<16x144xf32, #tpu.memory_space<vmem>>, vector<1x48xf32>,
    %76 = vector.extract_strided_slice %73 {offsets = [0, 48], sizes = [1, 48], strides = [1, 1]} : vector<1x192xf32> to vector<1x48xf32>
    %c9_51 = arith.constant 9 : index
    %c48_52 = arith.constant 48 : index
    %77 = vector.load %arg9[%c9_51, %c48_52] : memref<16x144xf32, #tpu.memory_space<vmem>>, vector<1x48xf32>
    tpu.vector_store %arg9[%c9_51, %c48_52], %76 {strides = array<i32>} : memref<16x144xf32, #tpu.memory_space<vmem>>, vector<1x48xf32>,
    %78 = vector.extract_strided_slice %73 {offsets = [0, 96], sizes = [1, 48], strides = [1, 1]} : vector<1x192xf32> to vector<1x48xf32>
    %c10_53 = arith.constant 10 : index
    %c48_54 = arith.constant 48 : index
    %79 = vector.load %arg9[%c10_53, %c48_54] : memref<16x144xf32, #tpu.memory_space<vmem>>, vector<1x48xf32>
    tpu.vector_store %arg9[%c10_53, %c48_54], %78 {strides = array<i32>} : memref<16x144xf32, #tpu.memory_space<vmem>>, vector<1x48xf32>,
    %80 = vector.extract_strided_slice %73 {offsets = [0, 144], sizes = [1, 48], strides = [1, 1]} : vector<1x192xf32> to vector<1x48xf32>
    %c11_55 = arith.constant 11 : index
    %c48_56 = arith.constant 48 : index
    %81 = vector.load %arg9[%c11_55, %c48_56] : memref<16x144xf32, #tpu.memory_space<vmem>>, vector<1x48xf32>
    tpu.vector_store %arg9[%c11_55, %c48_56], %80 {strides = array<i32>} : memref<16x144xf32, #tpu.memory_space<vmem>>, vector<1x48xf32>,
    %82 = vector.extract_strided_slice %14 {offsets = [7, 0], sizes = [1, 192], strides = [1, 1]} : vector<10x192xf32> to vector<1x192xf32>
    %83 = vector.extract_strided_slice %82 {offsets = [0, 0], sizes = [1, 48], strides = [1, 1]} : vector<1x192xf32> to vector<1x48xf32>
    %c8_57 = arith.constant 8 : index
    %c96_58 = arith.constant 96 : index
    %84 = vector.load %arg9[%c8_57, %c96_58] : memref<16x144xf32, #tpu.memory_space<vmem>>, vector<1x48xf32>
    tpu.vector_store %arg9[%c8_57, %c96_58], %83 {strides = array<i32>} : memref<16x144xf32, #tpu.memory_space<vmem>>, vector<1x48xf32>,
    %85 = vector.extract_strided_slice %82 {offsets = [0, 48], sizes = [1, 48], strides = [1, 1]} : vector<1x192xf32> to vector<1x48xf32>
    %c9_59 = arith.constant 9 : index
    %c96_60 = arith.constant 96 : index
    %86 = vector.load %arg9[%c9_59, %c96_60] : memref<16x144xf32, #tpu.memory_space<vmem>>, vector<1x48xf32>
    tpu.vector_store %arg9[%c9_59, %c96_60], %85 {strides = array<i32>} : memref<16x144xf32, #tpu.memory_space<vmem>>, vector<1x48xf32>,
    %87 = vector.extract_strided_slice %82 {offsets = [0, 96], sizes = [1, 48], strides = [1, 1]} : vector<1x192xf32> to vector<1x48xf32>
    %c10_61 = arith.constant 10 : index
    %c96_62 = arith.constant 96 : index
    %88 = vector.load %arg9[%c10_61, %c96_62] : memref<16x144xf32, #tpu.memory_space<vmem>>, vector<1x48xf32>
    tpu.vector_store %arg9[%c10_61, %c96_62], %87 {strides = array<i32>} : memref<16x144xf32, #tpu.memory_space<vmem>>, vector<1x48xf32>,
    %89 = vector.extract_strided_slice %82 {offsets = [0, 144], sizes = [1, 48], strides = [1, 1]} : vector<1x192xf32> to vector<1x48xf32>
    %c11_63 = arith.constant 11 : index
    %c96_64 = arith.constant 96 : index
    %90 = vector.load %arg9[%c11_63, %c96_64] : memref<16x144xf32, #tpu.memory_space<vmem>>, vector<1x48xf32>
    tpu.vector_store %arg9[%c11_63, %c96_64], %89 {strides = array<i32>} : memref<16x144xf32, #tpu.memory_space<vmem>>, vector<1x48xf32>,
    %91 = vector.extract_strided_slice %14 {offsets = [8, 0], sizes = [1, 192], strides = [1, 1]} : vector<10x192xf32> to vector<1x192xf32>
    %92 = vector.extract_strided_slice %91 {offsets = [0, 0], sizes = [1, 48], strides = [1, 1]} : vector<1x192xf32> to vector<1x48xf32>
    %c12_65 = arith.constant 12 : index
    %c0_66 = arith.constant 0 : index
    %93 = vector.load %arg9[%c12_65, %c0_66] : memref<16x144xf32, #tpu.memory_space<vmem>>, vector<1x48xf32>
    tpu.vector_store %arg9[%c12_65, %c0_66], %92 {strides = array<i32>} : memref<16x144xf32, #tpu.memory_space<vmem>>, vector<1x48xf32>,
    %94 = vector.extract_strided_slice %91 {offsets = [0, 48], sizes = [1, 48], strides = [1, 1]} : vector<1x192xf32> to vector<1x48xf32>
    %c13 = arith.constant 13 : index
    %c0_67 = arith.constant 0 : index
    %95 = vector.load %arg9[%c13, %c0_67] : memref<16x144xf32, #tpu.memory_space<vmem>>, vector<1x48xf32>
    tpu.vector_store %arg9[%c13, %c0_67], %94 {strides = array<i32>} : memref<16x144xf32, #tpu.memory_space<vmem>>, vector<1x48xf32>,
    %96 = vector.extract_strided_slice %91 {offsets = [0, 96], sizes = [1, 48], strides = [1, 1]} : vector<1x192xf32> to vector<1x48xf32>
    %c14 = arith.constant 14 : index
    %c0_68 = arith.constant 0 : index
    %97 = vector.load %arg9[%c14, %c0_68] : memref<16x144xf32, #tpu.memory_space<vmem>>, vector<1x48xf32>
    tpu.vector_store %arg9[%c14, %c0_68], %96 {strides = array<i32>} : memref<16x144xf32, #tpu.memory_space<vmem>>, vector<1x48xf32>,
    %98 = vector.extract_strided_slice %91 {offsets = [0, 144], sizes = [1, 48], strides = [1, 1]} : vector<1x192xf32> to vector<1x48xf32>
    %c15 = arith.constant 15 : index
    %c0_69 = arith.constant 0 : index
    %99 = vector.load %arg9[%c15, %c0_69] : memref<16x144xf32, #tpu.memory_space<vmem>>, vector<1x48xf32>
    tpu.vector_store %arg9[%c15, %c0_69], %98 {strides = array<i32>} : memref<16x144xf32, #tpu.memory_space<vmem>>, vector<1x48xf32>,
    %100 = vector.extract_strided_slice %14 {offsets = [9, 0], sizes = [1, 192], strides = [1, 1]} : vector<10x192xf32> to vector<1x192xf32>
    %101 = vector.extract_strided_slice %100 {offsets = [0, 0], sizes = [1, 48], strides = [1, 1]} : vector<1x192xf32> to vector<1x48xf32>
    %c12_70 = arith.constant 12 : index
    %c48_71 = arith.constant 48 : index
    %102 = vector.load %arg9[%c12_70, %c48_71] : memref<16x144xf32, #tpu.memory_space<vmem>>, vector<1x48xf32>
    tpu.vector_store %arg9[%c12_70, %c48_71], %101 {strides = array<i32>} : memref<16x144xf32, #tpu.memory_space<vmem>>, vector<1x48xf32>,
    %103 = vector.extract_strided_slice %100 {offsets = [0, 48], sizes = [1, 48], strides = [1, 1]} : vector<1x192xf32> to vector<1x48xf32>
    %c13_72 = arith.constant 13 : index
    %c48_73 = arith.constant 48 : index
    %104 = vector.load %arg9[%c13_72, %c48_73] : memref<16x144xf32, #tpu.memory_space<vmem>>, vector<1x48xf32>
    tpu.vector_store %arg9[%c13_72, %c48_73], %103 {strides = array<i32>} : memref<16x144xf32, #tpu.memory_space<vmem>>, vector<1x48xf32>,
    %105 = vector.extract_strided_slice %100 {offsets = [0, 96], sizes = [1, 48], strides = [1, 1]} : vector<1x192xf32> to vector<1x48xf32>
    %c14_74 = arith.constant 14 : index
    %c48_75 = arith.constant 48 : index
    %106 = vector.load %arg9[%c14_74, %c48_75] : memref<16x144xf32, #tpu.memory_space<vmem>>, vector<1x48xf32>
    tpu.vector_store %arg9[%c14_74, %c48_75], %105 {strides = array<i32>} : memref<16x144xf32, #tpu.memory_space<vmem>>, vector<1x48xf32>,
    %107 = vector.extract_strided_slice %100 {offsets = [0, 144], sizes = [1, 48], strides = [1, 1]} : vector<1x192xf32> to vector<1x48xf32>
    %c15_76 = arith.constant 15 : index
    %c48_77 = arith.constant 48 : index
    %108 = vector.load %arg9[%c15_76, %c48_77] : memref<16x144xf32, #tpu.memory_space<vmem>>, vector<1x48xf32>
    tpu.vector_store %arg9[%c15_76, %c48_77], %107 {strides = array<i32>} : memref<16x144xf32, #tpu.memory_space<vmem>>, vector<1x48xf32>,
    %c0_78 = arith.constant 0 : index
    %c0_79 = arith.constant 0 : index
    %109 = vector.load %arg9[%c0_78, %c0_79] : memref<16x144xf32, #tpu.memory_space<vmem>>, vector<16x144xf32>
    %c0_80 = arith.constant 0 : index
    %c0_81 = arith.constant 0 : index
    %110 = vector.load %arg4[%c0_80, %c0_81] : memref<144x32xf32, #tpu.memory_space<vmem>>, vector<144x32xf32>
    %cst_82 = arith.constant dense<0.000000e+00> : vector<16x32xf32>
    %111 = tpu.matmul %109, %110, %cst_82 {dimension_numbers = #tpu.dot_dimension_numbers<[1], [0], [0], [1], [0, 0, 1, 1], [], []>} : vector<16x144xf32>, vector<144x32xf32>, vector<16x32xf32> -> vector<16x32xf32>
    %c0_83 = arith.constant 0 : index
    %c0_84 = arith.constant 0 : index
    %112 = vector.load %arg5[%c0_83, %c0_84] : memref<1x32xf32, #tpu.memory_space<vmem>>, vector<1x32xf32>
    %113 = vector.broadcast %112 : vector<1x32xf32> to vector<16x32xf32>
    %114 = arith.addf %111, %113 : vector<16x32xf32>
    %cst_85 = arith.constant 0.000000e+00 : f32
    %115 = vector.broadcast %cst_85 : f32 to vector<16x32xf32>
    %116 = arith.cmpf ogt, %114, %115 : vector<16x32xf32>
    %cst_86 = arith.constant 0.000000e+00 : f32
    %117 = vector.broadcast %cst_86 : f32 to vector<16x32xf32>
    %118 = arith.minimumf %114, %117 : vector<16x32xf32>
    %119 = math.exp %118 : vector<16x32xf32>
    %cst_87 = arith.constant 1.000000e+00 : f32
    %120 = vector.broadcast %cst_87 : f32 to vector<16x32xf32>
    %121 = arith.subf %119, %120 : vector<16x32xf32>
    %122 = arith.select %116, %114, %121 : vector<16x32xi1>, vector<16x32xf32>
    %123 = vector.extract_strided_slice %122 {offsets = [0, 0], sizes = [1, 32], strides = [1, 1]} : vector<16x32xf32> to vector<1x32xf32>
    %c0_88 = arith.constant 0 : index
    %c0_89 = arith.constant 0 : index
    %124 = vector.load %arg10[%c0_88, %c0_89] : memref<1x512xf32, #tpu.memory_space<vmem>>, vector<1x32xf32>
    tpu.vector_store %arg10[%c0_88, %c0_89], %123 {strides = array<i32>} : memref<1x512xf32, #tpu.memory_space<vmem>>, vector<1x32xf32>,
    %125 = vector.extract_strided_slice %122 {offsets = [1, 0], sizes = [1, 32], strides = [1, 1]} : vector<16x32xf32> to vector<1x32xf32>
    %c0_90 = arith.constant 0 : index
    %c32 = arith.constant 32 : index
    %126 = vector.load %arg10[%c0_90, %c32] : memref<1x512xf32, #tpu.memory_space<vmem>>, vector<1x32xf32>
    tpu.vector_store %arg10[%c0_90, %c32], %125 {strides = array<i32>} : memref<1x512xf32, #tpu.memory_space<vmem>>, vector<1x32xf32>,
    %127 = vector.extract_strided_slice %122 {offsets = [2, 0], sizes = [1, 32], strides = [1, 1]} : vector<16x32xf32> to vector<1x32xf32>
    %c0_91 = arith.constant 0 : index
    %c64 = arith.constant 64 : index
    %128 = vector.load %arg10[%c0_91, %c64] : memref<1x512xf32, #tpu.memory_space<vmem>>, vector<1x32xf32>
    tpu.vector_store %arg10[%c0_91, %c64], %127 {strides = array<i32>} : memref<1x512xf32, #tpu.memory_space<vmem>>, vector<1x32xf32>,
    %129 = vector.extract_strided_slice %122 {offsets = [3, 0], sizes = [1, 32], strides = [1, 1]} : vector<16x32xf32> to vector<1x32xf32>
    %c0_92 = arith.constant 0 : index
    %c96_93 = arith.constant 96 : index
    %130 = vector.load %arg10[%c0_92, %c96_93] : memref<1x512xf32, #tpu.memory_space<vmem>>, vector<1x32xf32>
    tpu.vector_store %arg10[%c0_92, %c96_93], %129 {strides = array<i32>} : memref<1x512xf32, #tpu.memory_space<vmem>>, vector<1x32xf32>,
    %131 = vector.extract_strided_slice %122 {offsets = [4, 0], sizes = [1, 32], strides = [1, 1]} : vector<16x32xf32> to vector<1x32xf32>
    %c0_94 = arith.constant 0 : index
    %c128 = arith.constant 128 : index
    %132 = vector.load %arg10[%c0_94, %c128] : memref<1x512xf32, #tpu.memory_space<vmem>>, vector<1x32xf32>
    tpu.vector_store %arg10[%c0_94, %c128], %131 {strides = array<i32>} : memref<1x512xf32, #tpu.memory_space<vmem>>, vector<1x32xf32>,
    %133 = vector.extract_strided_slice %122 {offsets = [5, 0], sizes = [1, 32], strides = [1, 1]} : vector<16x32xf32> to vector<1x32xf32>
    %c0_95 = arith.constant 0 : index
    %c160 = arith.constant 160 : index
    %134 = vector.load %arg10[%c0_95, %c160] : memref<1x512xf32, #tpu.memory_space<vmem>>, vector<1x32xf32>
    tpu.vector_store %arg10[%c0_95, %c160], %133 {strides = array<i32>} : memref<1x512xf32, #tpu.memory_space<vmem>>, vector<1x32xf32>,
    %135 = vector.extract_strided_slice %122 {offsets = [6, 0], sizes = [1, 32], strides = [1, 1]} : vector<16x32xf32> to vector<1x32xf32>
    %c0_96 = arith.constant 0 : index
    %c192 = arith.constant 192 : index
    %136 = vector.load %arg10[%c0_96, %c192] : memref<1x512xf32, #tpu.memory_space<vmem>>, vector<1x32xf32>
    tpu.vector_store %arg10[%c0_96, %c192], %135 {strides = array<i32>} : memref<1x512xf32, #tpu.memory_space<vmem>>, vector<1x32xf32>,
    %137 = vector.extract_strided_slice %122 {offsets = [7, 0], sizes = [1, 32], strides = [1, 1]} : vector<16x32xf32> to vector<1x32xf32>
    %c0_97 = arith.constant 0 : index
    %c224 = arith.constant 224 : index
    %138 = vector.load %arg10[%c0_97, %c224] : memref<1x512xf32, #tpu.memory_space<vmem>>, vector<1x32xf32>
    tpu.vector_store %arg10[%c0_97, %c224], %137 {strides = array<i32>} : memref<1x512xf32, #tpu.memory_space<vmem>>, vector<1x32xf32>,
    %139 = vector.extract_strided_slice %122 {offsets = [8, 0], sizes = [1, 32], strides = [1, 1]} : vector<16x32xf32> to vector<1x32xf32>
    %c0_98 = arith.constant 0 : index
    %c256 = arith.constant 256 : index
    %140 = vector.load %arg10[%c0_98, %c256] : memref<1x512xf32, #tpu.memory_space<vmem>>, vector<1x32xf32>
    tpu.vector_store %arg10[%c0_98, %c256], %139 {strides = array<i32>} : memref<1x512xf32, #tpu.memory_space<vmem>>, vector<1x32xf32>,
    %141 = vector.extract_strided_slice %122 {offsets = [9, 0], sizes = [1, 32], strides = [1, 1]} : vector<16x32xf32> to vector<1x32xf32>
    %c0_99 = arith.constant 0 : index
    %c288 = arith.constant 288 : index
    %142 = vector.load %arg10[%c0_99, %c288] : memref<1x512xf32, #tpu.memory_space<vmem>>, vector<1x32xf32>
    tpu.vector_store %arg10[%c0_99, %c288], %141 {strides = array<i32>} : memref<1x512xf32, #tpu.memory_space<vmem>>, vector<1x32xf32>,
    %143 = vector.extract_strided_slice %122 {offsets = [10, 0], sizes = [1, 32], strides = [1, 1]} : vector<16x32xf32> to vector<1x32xf32>
    %c0_100 = arith.constant 0 : index
    %c320 = arith.constant 320 : index
    %144 = vector.load %arg10[%c0_100, %c320] : memref<1x512xf32, #tpu.memory_space<vmem>>, vector<1x32xf32>
    tpu.vector_store %arg10[%c0_100, %c320], %143 {strides = array<i32>} : memref<1x512xf32, #tpu.memory_space<vmem>>, vector<1x32xf32>,
    %145 = vector.extract_strided_slice %122 {offsets = [11, 0], sizes = [1, 32], strides = [1, 1]} : vector<16x32xf32> to vector<1x32xf32>
    %c0_101 = arith.constant 0 : index
    %c352 = arith.constant 352 : index
    %146 = vector.load %arg10[%c0_101, %c352] : memref<1x512xf32, #tpu.memory_space<vmem>>, vector<1x32xf32>
    tpu.vector_store %arg10[%c0_101, %c352], %145 {strides = array<i32>} : memref<1x512xf32, #tpu.memory_space<vmem>>, vector<1x32xf32>,
    %147 = vector.extract_strided_slice %122 {offsets = [12, 0], sizes = [1, 32], strides = [1, 1]} : vector<16x32xf32> to vector<1x32xf32>
    %c0_102 = arith.constant 0 : index
    %c384 = arith.constant 384 : index
    %148 = vector.load %arg10[%c0_102, %c384] : memref<1x512xf32, #tpu.memory_space<vmem>>, vector<1x32xf32>
    tpu.vector_store %arg10[%c0_102, %c384], %147 {strides = array<i32>} : memref<1x512xf32, #tpu.memory_space<vmem>>, vector<1x32xf32>,
    %149 = vector.extract_strided_slice %122 {offsets = [13, 0], sizes = [1, 32], strides = [1, 1]} : vector<16x32xf32> to vector<1x32xf32>
    %c0_103 = arith.constant 0 : index
    %c416 = arith.constant 416 : index
    %150 = vector.load %arg10[%c0_103, %c416] : memref<1x512xf32, #tpu.memory_space<vmem>>, vector<1x32xf32>
    tpu.vector_store %arg10[%c0_103, %c416], %149 {strides = array<i32>} : memref<1x512xf32, #tpu.memory_space<vmem>>, vector<1x32xf32>,
    %151 = vector.extract_strided_slice %122 {offsets = [14, 0], sizes = [1, 32], strides = [1, 1]} : vector<16x32xf32> to vector<1x32xf32>
    %c0_104 = arith.constant 0 : index
    %c448 = arith.constant 448 : index
    %152 = vector.load %arg10[%c0_104, %c448] : memref<1x512xf32, #tpu.memory_space<vmem>>, vector<1x32xf32>
    tpu.vector_store %arg10[%c0_104, %c448], %151 {strides = array<i32>} : memref<1x512xf32, #tpu.memory_space<vmem>>, vector<1x32xf32>,
    %153 = vector.extract_strided_slice %122 {offsets = [15, 0], sizes = [1, 32], strides = [1, 1]} : vector<16x32xf32> to vector<1x32xf32>
    %c0_105 = arith.constant 0 : index
    %c480 = arith.constant 480 : index
    %154 = vector.load %arg10[%c0_105, %c480] : memref<1x512xf32, #tpu.memory_space<vmem>>, vector<1x32xf32>
    tpu.vector_store %arg10[%c0_105, %c480], %153 {strides = array<i32>} : memref<1x512xf32, #tpu.memory_space<vmem>>, vector<1x32xf32>,
    %c0_106 = arith.constant 0 : index
    %c0_107 = arith.constant 0 : index
    %155 = vector.load %arg10[%c0_106, %c0_107] : memref<1x512xf32, #tpu.memory_space<vmem>>, vector<1x512xf32>
    %c0_108 = arith.constant 0 : index
    %c0_109 = arith.constant 0 : index
    %156 = vector.load %arg6[%c0_108, %c0_109] : memref<512x32xf32, #tpu.memory_space<vmem>>, vector<512x32xf32>
    %cst_110 = arith.constant dense<0.000000e+00> : vector<1x32xf32>
    %157 = tpu.matmul %155, %156, %cst_110 {dimension_numbers = #tpu.dot_dimension_numbers<[1], [0], [0], [1], [0, 0, 1, 1], [], []>} : vector<1x512xf32>, vector<512x32xf32>, vector<1x32xf32> -> vector<1x32xf32>
    %c0_111 = arith.constant 0 : index
    %c0_112 = arith.constant 0 : index
    %158 = vector.load %arg7[%c0_111, %c0_112] : memref<1x32xf32, #tpu.memory_space<vmem>>, vector<1x32xf32>
    %159 = arith.addf %157, %158 : vector<1x32xf32>
    %cst_113 = arith.constant 0.000000e+00 : f32
    %160 = vector.broadcast %cst_113 : f32 to vector<1x32xf32>
    %161 = arith.cmpf ogt, %159, %160 : vector<1x32xf32>
    %cst_114 = arith.constant 0.000000e+00 : f32
    %162 = vector.broadcast %cst_114 : f32 to vector<1x32xf32>
    %163 = arith.minimumf %159, %162 : vector<1x32xf32>
    %164 = math.exp %163 : vector<1x32xf32>
    %cst_115 = arith.constant 1.000000e+00 : f32
    %165 = vector.broadcast %cst_115 : f32 to vector<1x32xf32>
    %166 = arith.subf %164, %165 : vector<1x32xf32>
    %167 = arith.select %161, %159, %166 : vector<1x32xi1>, vector<1x32xf32>
    %c0_116 = arith.constant 0 : index
    %c0_117 = arith.constant 0 : index
    %c0_118 = arith.constant 0 : index
    %168 = vector.load %arg8[%c0_116, %c0_117, %c0_118] : memref<1x1x32xf32, #tpu.memory_space<vmem>>, vector<1x1x32xf32>
    %169 = vector.shape_cast %168 : vector<1x1x32xf32> to vector<1x32xf32>
    %170 = vector.shape_cast %167 : vector<1x32xf32> to vector<1x1x32xf32>
    tpu.vector_store %arg8[%c0_116, %c0_117, %c0_118], %170 {strides = array<i32>} : memref<1x1x32xf32, #tpu.memory_space<vmem>>, vector<1x1x32xf32>,
    return
  }
  func.func @transform_0(%arg0: i32) -> (i32, i32, i32) {
    %c0_i32 = arith.constant 0 : i32
    %c0_i32_0 = arith.constant 0 : i32
    %c0_i32_1 = arith.constant 0 : i32
    return %arg0, %c0_i32, %c0_i32_0 : i32, i32, i32
  }
  func.func @transform_1(%arg0: i32) -> (i32, i32) {
    %c0_i32 = arith.constant 0 : i32
    %c0_i32_0 = arith.constant 0 : i32
    %c0_i32_1 = arith.constant 0 : i32
    return %c0_i32, %c0_i32_0 : i32, i32
  }
  func.func @transform_2(%arg0: i32) -> (i32, i32) {
    %c0_i32 = arith.constant 0 : i32
    %c0_i32_0 = arith.constant 0 : i32
    %c0_i32_1 = arith.constant 0 : i32
    return %c0_i32, %c0_i32_0 : i32, i32
  }
  func.func @transform_3(%arg0: i32) -> (i32, i32) {
    %c0_i32 = arith.constant 0 : i32
    %c0_i32_0 = arith.constant 0 : i32
    %c0_i32_1 = arith.constant 0 : i32
    return %c0_i32, %c0_i32_0 : i32, i32
  }
  func.func @transform_4(%arg0: i32) -> (i32, i32) {
    %c0_i32 = arith.constant 0 : i32
    %c0_i32_0 = arith.constant 0 : i32
    %c0_i32_1 = arith.constant 0 : i32
    return %c0_i32, %c0_i32_0 : i32, i32
  }
  func.func @transform_5(%arg0: i32) -> (i32, i32) {
    %c0_i32 = arith.constant 0 : i32
    %c0_i32_0 = arith.constant 0 : i32
    %c0_i32_1 = arith.constant 0 : i32
    return %c0_i32, %c0_i32_0 : i32, i32
  }
  func.func @transform_6(%arg0: i32) -> (i32, i32) {
    %c0_i32 = arith.constant 0 : i32
    %c0_i32_0 = arith.constant 0 : i32
    %c0_i32_1 = arith.constant 0 : i32
    return %c0_i32, %c0_i32_0 : i32, i32
  }
  func.func @transform_7(%arg0: i32) -> (i32, i32, i32) {
    %c0_i32 = arith.constant 0 : i32
    %c0_i32_0 = arith.constant 0 : i32
    %c0_i32_1 = arith.constant 0 : i32
    return %arg0, %c0_i32, %c0_i32_0 : i32, i32, i32
  }
}

</mosaic_0001>

<bundles_post_ra>
// kernel: downscaler_forward.1
= control target key start
LH: loop header
LB: loop body
LE: loop exit
PB: predicated region body
PF: predicated region fallthrough
CT: control target
= control target key end

     0   :  { %12 = vsyncpa [#allocation5], 0  ;;  %s1867_s0 = inlined_call_operand.vmem [shape: f32[2,10,90], index: 0, kind: input, shape index: {}]   ;;  %s1868_s1 = inlined_call_operand.vmem [shape: f32[90,192], index: 1, kind: input, shape index: {}]   ;;  %s1869_s2 = inlined_call_operand.vmem [shape: f32[1,192], index: 2, kind: input, shape index: {}]   ;;  %s1870_s3 = inlined_call_operand.vmem [shape: f32[144,32], index: 3, kind: input, shape index: {}]   ;;  %s1871_s4 = inlined_call_operand.vmem [shape: f32[1,32], index: 4, kind: input, shape index: {}]   ;;  %s1872_s5 = inlined_call_operand.vmem [shape: f32[512,32], index: 5, kind: input, shape index: {}]   ;;  %s1873_s6 = inlined_call_operand.vmem [shape: f32[1,32], index: 6, kind: input, shape index: {}]   ;;  %s1874_s7 = inlined_call_operand.hbm [shape: f32[2,1,32], index: 7, kind: output, shape index: {}]  }
   0x1   :  { %14 = vsyncpa [#allocation5 + $0x1], 0  ;;  %s1227_s24 = smov 0   ;;  %s1229_s25 = smov 0  }
   0x2   :  { %s1231_s26 = smov 0   ;;  %s1233_s27 = smov 0  }
   0x3 LB: > { %s1248_s28 = sadd.s32 4294967295, %s1178_s27   ;;  %s1031_s29 = sadd.s32 4294967294, %s1178_s27   ;;  %s1178_s27 = sphi %s1233_s27, %s1888_s27   ;;  %s1174_s26 = sphi %s1231_s26, %s1887_s26   ;;  %s1170_s25 = sphi %s1229_s25, %s1886_s25   ;;  %s1166_s24 = sphi %s1227_s24, %s1885_s24  }
   0x4   : > { %s1252_s30 = sadd.s32 1, %s1178_s27   ;;  %s179_s8 = sadd.s32 1, %s1174_s26 }
   0x5   : > { %s176_s9 = ssub.s32 %s1178_s27, %s1252_s30  ;;  %p189_p0 = scmp.ne.s32.totalorder %s1174_s26, %s1170_s25 }
   0x6   : > { %p177_p1 = scmp.eq.s32.totalorder %s176_s9, 0  ;;  %p190_p2 = scmp.eq.s32.totalorder %s1248_s28, 1 }
   0x7   : > { %p195_p3 = scmp.ne.s32.totalorder %s1170_s25, %s1166_s24  ;;  %p196_p4 = scmp.eq.s32.totalorder %s1031_s29, 1 }
   0x8   : > { %s1263_s10 = scalar_select %p177_p1, %s1174_s26, %s179_s8  }
   0x9   : > { %p1265_p5 = por %p190_p2, %p189_p0  ;;  %p1269_p6 = por %p196_p4, %p195_p3 }
   0xa   : > { %p1034_p7 = scmp.ge.s32.totalorder %s1178_s27, 1  ;;  %p240_p8 = scmp.lt.s32.totalorder %s1178_s27, 3 }
   0xc   : > { %p241_p9 = pnand %p1034_p7, %p240_p8 }
   0xd   : > { %p271_p10 = scmp.lt.s32.totalorder (!%p241_p9), %s1248_s28, 1  ;;  %s1181_s9 = smov (!%p241_p9), 48  }
   0xe   : > { %244 = sbr.rel (%p241_p9) target bundleno = 895 (0x37f), region = 48  ;;  %s1182_s14 = smov (!%p241_p9), 80  }
   0xf   : > { %s1183_s15 = smov (!%p241_p9), 32   ;;  %s1184_s16 = smov (!%p241_p9), 112  }
  0x10   : > { %s1185_s17 = smov (!%p241_p9), 96   ;;  %s269_s23 = sand.u32 (!%p241_p9), 1, %s1170_s25  }
  0x11   : > { %s972_s8 = scalar_lea.hbm (!%p241_p9), %s1874_s7, %s1248_s28  ;;  %s964_s18 = scalar_lea.sflag (!%p241_p9), [#allocation5], %s269_s23 }
  0x13   : > { %v300_v0 = vld [vmem:[%s1868_s1 + $0xb0] sm:$0x3]  ;;  %vm315_vm0 = vcmask 1041408   ;;  %v301_v1 = vld [vmem:[%s1868_s1 + $0xb8] sm:$0x3]  ;;  %v298_v2 = vld [vmem:[%s1868_s1 + $0xa0] sm:$0xff] }
  0x14   : > { %1037 = vmatpush.msk.msra.mxu0 %vm315_vm0, %v300_v0  ;;  %1040 = vmatpush.msk.msra.mxu1 %vm315_vm0, %v301_v1  ;;  %v299_v3 = vld [vmem:[%s1868_s1 + $0xa8] sm:$0xff]  ;;  %v296_v4 = vld [vmem:[%s1868_s1 + $0x90] sm:$0xff]  ;;  %v297_v5 = vld [vmem:[%s1868_s1 + $0x98] sm:$0xff]  ;;  %s272_s13 = scalar_select %p271_p10, %s1248_s28, 1  ;;  %vm308_vm1 = vcmask 736256   ;;  %vm392_vm2 = vcmask 388096  }
  0x15   : > { %v294_v6 = vld [vmem:[%s1868_s1 + $0x80] sm:$0xff]  ;;  %v295_v7 = vld [vmem:[%s1868_s1 + $0x88] sm:$0xff]  ;;  %v292_v8 = vld [vmem:[%s1868_s1 + $0x70] sm:$0xff]  ;;  %v1180_v26 = vmov 0.0   ;;  %vm402_vm3 = vcmask 778624   ;;  %vm443_vm6 = vcmask 385024  }
  0x16   : > { %327 = vmatpush.msra.mxu0 %v298_v2  ;;  %350 = vmatpush.msra.mxu1 %v299_v3  ;;  %v293_v9 = vld [vmem:[%s1868_s1 + $0x78] sm:$0xff]  ;;  %v290_v10 = vld [vmem:[%s1868_s1 + $0x60] sm:$0xff]  ;;  %v291_v11 = vld [vmem:[%s1868_s1 + $0x68] sm:$0xff]  ;;  %s1054_s22 = sshll.u32 %s272_s13, 4  ;;  %393 = vst.msk [vmem:[#allocation2] sm:$0xf] %vm392_vm2, %v1180_v26 }
  0x17   : > { %v288_v12 = vld [vmem:[%s1868_s1 + $0x50] sm:$0xff]  ;;  %v289_v13 = vld [vmem:[%s1868_s1 + $0x58] sm:$0xff]  ;;  %v286_v14 = vld [vmem:[%s1868_s1 + $0x40] sm:$0xff]  ;;  %s275_s19 = scalar_lea.vmem %s1867_s0, %s1054_s22  ;;  %vm424_vm7 = vcmask 122880   ;;  %vm394_vm9 = vcmask 1048324   ;;  %vm396_vm10 = vcmask 130052  }
  0x18   : > { %328 = vmatpush.msra.mxu0 %v296_v4  ;;  %351 = vmatpush.msra.mxu1 %v297_v5  ;;  %v287_v15 = vld [vmem:[%s1868_s1 + $0x48] sm:$0xff]  ;;  %v284_v16 = vld [vmem:[%s1868_s1 + $0x30] sm:$0xff]  ;;  %v285_v17 = vld [vmem:[%s1868_s1 + $0x38] sm:$0xff]  ;;  %395 = vst.msk [vmem:[#allocation2 + $0x10] sm:$0xf0] %vm394_vm9, %v1180_v26  ;;  %vm410_vm12 = vcmask 654336  }
  0x19   : > { %v282_v18 = vld [vmem:[%s1868_s1 + $0x20] sm:$0xff]  ;;  %v283_v19 = vld [vmem:[%s1868_s1 + $0x28] sm:$0xff]  ;;  %v280_v20 = vld [vmem:[%s1868_s1 + $0x10] sm:$0xff]  ;;  %397 = vst.msk [vmem:[#allocation2 + $0x18] sm:$0xf0] %vm396_vm10, %v1180_v26  ;;  %vm422_vm13 = vcmask 1041152  }
  0x1a   : > { %329 = vmatpush.msra.mxu0 %v294_v6  ;;  %352 = vmatpush.msra.mxu1 %v295_v7  ;;  %v281_v21 = vld [vmem:[%s1868_s1 + $0x18] sm:$0xff]  ;;  %v278_v22 = vld [vmem:[%s1868_s1] sm:$0xff]  ;;  %v279_v23 = vld [vmem:[%s1868_s1 + $0x8] sm:$0xff]  ;;  %vm454_vm14 = vcmask 261120   ;;  %vm624_vm15 = vcmask 130048  }
  0x1b   : > { %v276_v24 = vld [vmem:[%s275_s19] sm:$0xff]  ;;  %v277_v25 = vld [vmem:[%s275_s19 + $0x8] sm:$0x3]  ;;  %s1186_s19 = smov 64  }
  0x1c   : > { %330 = vmatpush.msra.mxu0 %v292_v8  ;;  %353 = vmatpush.msra.mxu1 %v293_v9  ;;  %v1356_v27 = vld [vmem:[%s1869_s2] sm:$0x3]  ;;  %v607_v26 = vld [vmem:[%s1870_s3 + $0x28] sm:$0xff] }
  0x1d   : > { %v304_v28 = vperm.slane %v1356_v27, 0  ;;  %v305_v29 = vperm.slane %v1356_v27, 1 }
  0x1e   : > { %331 = vmatpush.msra.mxu0 %v290_v10  ;;  %354 = vmatpush.msra.mxu1 %v291_v11 }
  0x20   : > { %332 = vmatpush.msra.mxu0 %v288_v12  ;;  %355 = vmatpush.msra.mxu1 %v289_v13  ;;  %v617_v12 = vld [vmem:[%s1870_s3 + $0x78] sm:$0xff]  ;;  %v616_v13 = vld [vmem:[%s1870_s3 + $0x70] sm:$0xff] }
  0x21   : > { %631 = vmatpush.msra.mxu2 %v617_v12  ;;  %v1101_v12 = vld [vmem:[%s1871_s4] ss:$0 sm:$0xff] }
  0x22   : > { %333 = vmatpush.msra.mxu0 %v286_v14  ;;  %356 = vmatpush.msra.mxu1 %v287_v15  ;;  %v615_v14 = vld [vmem:[%s1870_s3 + $0x68] sm:$0xff]  ;;  %v614_v15 = vld [vmem:[%s1870_s3 + $0x60] sm:$0xff] }
  0x23   : > { %632 = vmatpush.msra.mxu2 %v616_v13 }
  0x24   : > { %334 = vmatpush.msra.mxu0 %v284_v16  ;;  %357 = vmatpush.msra.mxu1 %v285_v17  ;;  %v613_v17 = vld [vmem:[%s1870_s3 + $0x58] sm:$0xff] }
  0x25   : > { %633 = vmatpush.msra.mxu2 %v615_v14 }
  0x26   : > { %335 = vmatpush.msra.mxu0 %v282_v18  ;;  %358 = vmatpush.msra.mxu1 %v283_v19  ;;  %v612_v18 = vld [vmem:[%s1870_s3 + $0x50] sm:$0xff]  ;;  %v611_v19 = vld [vmem:[%s1870_s3 + $0x48] sm:$0xff] }
  0x27   : > { %634 = vmatpush.msra.mxu2 %v614_v15 }
  0x28   : > { %336 = vmatpush.msra.mxu0 %v280_v20  ;;  %359 = vmatpush.msra.mxu1 %v281_v21 }
  0x29   : > { %635 = vmatpush.msra.mxu2 %v613_v17 }
  0x2a   : > { %337 = vmatpush.msra.mxu0 %v278_v22  ;;  %360 = vmatpush.msra.mxu1 %v279_v23  ;;  %v610_v23 = vld [vmem:[%s1870_s3 + $0x40] sm:$0xff] }
  0x2b   : > { %1038 = vmatmul.msk.f32.vlgmr.msra.gmra.mxu0 %vm308_vm1, %v276_v24  ;;  %1041 = vmatmul.msk.f32.vlgmr.msra.gmra.mxu1 %vm308_vm1, %v276_v24  ;;  %v609_v24 = vld [vmem:[%s1870_s3 + $0x38] sm:$0xff] }
  0x2c   : > { %636 = vmatpush.msra.mxu2 %v612_v18 }
  0x2e   : > { %637 = vmatpush.msra.mxu2 %v611_v19  ;;  %v689_v19 = vlaneseq }
  0x30   : > { %638 = vmatpush.msra.mxu2 %v610_v23  ;;  %vm721_vm9 = vcmp.ge.s32.totalorder %v689_v19, 96  ;;  %vm722_vm10 = vcmp.lt.s32.totalorder %v689_v19, 128 }
  0x32   : > { %639 = vmatpush.msra.mxu2 %v609_v24 }
  0x33   : > { %1042 = vmatmul.msk.f32.gmra.mxu1 %vm308_vm1, %v277_v25  ;;  %1039 = vmatmul.msk.f32.gmra.mxu0 %vm308_vm1, %v277_v25  ;;  %v608_v25 = vld [vmem:[%s1870_s3 + $0x30] sm:$0xff]  ;;  %vm1574_vm1 = vcmp.lt.s32.totalorder %v689_v19, 32 }
  0x34   : > { %640 = vmatpush.msra.mxu2 %v608_v25 }
  0x36   : > { %641 = vmatpush.msra.mxu2 %v607_v26 }
  0xa8   : > { %v339_v30 = vpop.f32.mrf.mxu0  ;;  %v362_v31 = vpop.f32.mrf.mxu1 }
  0xa9   : > { %v340_v32 = vadd.f32 %v339_v30, %v304_v28  ;;  %v363_v33 = vadd.f32 %v362_v31, %v305_v29  ;;  %v606_v31 = vld [vmem:[%s1870_s3 + $0x20] sm:$0xff] }
  0xaa   : > { %642 = vmatpush.msra.mxu2 %v606_v31 }
  0xab   : > { %v372_v34 = vmin.f32 %v340_v32, 0.0  ;;  %v373_v35 = vmin.f32 %v363_v33, 0.0  ;;  %vm368_vm4 = vcmp.gt.f32.partialorder %v340_v32, 0.0  ;;  %vm369_vm5 = vcmp.gt.f32.partialorder %v363_v33, 0.0 }
  0xad   : > { %v376_v36 = vmul.f32 1.442695, %v372_v34  ;;  %v378_v37 = vmul.f32 1.442695, %v373_v35  ;;  %v619_v34 = vld [vmem:[%s1870_s3 + $0x88] sm:$0xff]  ;;  %v618_v35 = vld [vmem:[%s1870_s3 + $0x80] sm:$0xff] }
  0xae   : > { %668 = vmatpush.msra.mxu3 %v619_v34 }
  0xaf   : > { %1102 = vpow2.f32 %v376_v36  ;;  %v603_v36 = vld [vmem:[%s1870_s3 + $0x8] sm:$0xff] }
  0xb0   : > { %1104 = vpow2.f32 %v378_v37  ;;  %v342_v51 = vpop.f32.mrf.mxu0  ;;  %v365_v59 = vpop.f32.mrf.mxu1  ;;  %669 = vmatpush.msra.mxu3 %v618_v35 }
  0xb1   : > { %v343_v52 = vadd.f32 %v342_v51, %v304_v28  ;;  %v366_v62 = vadd.f32 %v365_v59, %v305_v29 }
  0xb3   : > { %v374_v53 = vmin.f32 %v343_v52, 0.0  ;;  %vm370_vm8 = vcmp.gt.f32.partialorder %v343_v52, 0.0  ;;  %v375_v63 = vmin.f32 %v366_v62, 0.0  ;;  %vm371_vm11 = vcmp.gt.f32.partialorder %v366_v62, 0.0 }
  0xb5   : > { %v1103_v38 = vpop.eup %1102  ;;  %v380_v55 = vmul.f32 1.442695, %v374_v53  ;;  %v382_v0 = vmul.f32 1.442695, %v375_v63 }
  0xb6   : > { %v1105_v39 = vpop.eup %1104  ;;  %v1043_v40 = vadd.f32 -1.0, %v1103_v38 }
  0xb7   : > { %v1044_v41 = vadd.f32 -1.0, %v1105_v39  ;;  %1106 = vpow2.f32 %v380_v55 }
  0xb8   : > { %v1362_v42 = vsel %vm368_vm4, %v340_v32, %v1043_v40  ;;  %1108 = vpow2.f32 %v382_v0  ;;  %v605_v32 = vld [vmem:[%s1870_s3 + $0x18] sm:$0xff]  ;;  %v602_v40 = vld [vmem:[%s1870_s3] sm:$0xff]  ;;  %vm702_vm4 = vcmp.lt.s32.totalorder %v689_v19, 64 }
  0xb9   : > { %v1364_v43 = vsel %vm369_vm5, %v363_v33, %v1044_v41  ;;  %399 = vrot.lane.b32.xlu2 %v1362_v42, %s1181_s9  ;;  %406 = vrot.lane.b32.xlu1 %v1362_v42, %s1182_s14  ;;  %v441_v44 = vrot.slane %v1362_v42, 2  ;;  %404 = vst.msk [vmem:[#allocation2 + $0x1] sm:$0x1] %vm402_vm3, %v1362_v42  ;;  %v502_v47 = vrot.slane %v1362_v42, 5  ;;  %v462_v54 = vrot.slane %v1362_v42, 3  ;;  %v604_v33 = vld [vmem:[%s1870_s3 + $0x10] sm:$0xff] }
  0xba   : > { %414 = vrot.lane.b32.xlu0 %v1364_v43, %s1183_s15  ;;  %v431_v45 = vrot.slane %v1364_v43, 1  ;;  %v492_v46 = vrot.slane %v1364_v43, 4  ;;  %v551_v48 = vrot.slane %v1364_v43, 7  ;;  %v469_v49 = vrot.slane %v1364_v43, 3  ;;  %643 = vmatpush.msra.mxu2 %v605_v32 }
  0xbb   : > { %444 = vst.msk [vmem:[#allocation2 + $0x4] sm:$0x1] %vm443_vm6, %v441_v44  ;;  %v449_v50 = vrot.slane %v1364_v43, 2  ;;  %v1400_v57 = vrot.slane %v1362_v42, 1  ;;  %v1408_v61 = vrot.slane %v1362_v42, 4  ;;  %v509_v1 = vrot.slane %v1364_v43, 5 }
  0xbc   : > { %435 = vst.msk [vmem:[#allocation2 + $0xa] sm:$0x1] %vm424_vm7, %v431_v45  ;;  %v528_v2 = vrot.slane %v1364_v43, 6  ;;  %v1425_v3 = vrot.slane %v1362_v42, 6  ;;  %v1437_v7 = vrot.slane %v1362_v42, 7  ;;  %644 = vmatpush.msra.mxu2 %v604_v33  ;;  %vm711_vm5 = vcmp.ge.s32.totalorder %v689_v19, 64 }
  0xbd   : > { %496 = vst.msk [vmem:[#allocation2 + $0xe] sm:$0x1] %vm424_vm7, %v492_v46  ;;  %v1107_v56 = vpop.eup %1106 }
  0xbe   : > { %555 = vst.msk [vmem:[#allocation2 + $0x1a] sm:$0x1] %vm424_vm7, %v551_v48  ;;  %v1045_v58 = vadd.f32 -1.0, %v1107_v56  ;;  %v1109_v4 = vpop.eup %1108  ;;  %645 = vmatpush.msra.mxu2 %v603_v36 }
  0xbf   : > { %504 = vst.msk [vmem:[#allocation2 + $0x10] sm:$0x1] %vm443_vm6, %v502_v47  ;;  %v1046_v5 = vadd.f32 -1.0, %v1109_v4 }
  0xc0   : > { %v390_v60 = vsel %vm370_vm8, %v343_v52, %v1045_v58  ;;  %646 = vmatpush.msra.mxu2 %v602_v40 }
  0xc1   : > { %408 = vrot.lane.b32.xlu1 %v1364_v43, %s1182_s14  ;;  %445 = vrot.lane.b32.xlu2 %v441_v44, %s1182_s14  ;;  %561 = vst.msk [vmem:[#allocation2 + $0x14] sm:$0x1] %vm443_vm6, %v390_v60  ;;  %v391_v6 = vsel %vm371_vm11, %v366_v62, %v1046_v5  ;;  %v1447_v9 = vrot.slane %v390_v60, 1  ;;  %vm1618_vm11 = vmand %vm721_vm9, %vm722_vm10 }
  0xc2   : > { %450 = vrot.lane.b32.xlu0 %v441_v44, %s1183_s15  ;;  %v586_v8 = vrot.slane %v391_v6, 1 }
  0xc9   : > { %472 = vrot.lane.b32.xlu1 %v469_v49, %s1182_s14  ;;  %458 = vrot.lane.b32.xlu2 %v449_v50, %s1184_s16 }
  0xca   : > { %452 = vrot.lane.b32.xlu0 %v449_v50, %s1183_s15 }
  0xd1   : > { %463 = vrot.lane.b32.xlu1 %v462_v54, %s1181_s9  ;;  %477 = vrot.lane.b32.xlu2 %v469_v49, %s1183_s15 }
  0xd2   : > { %470 = vrot.lane.b32.xlu0 %v462_v54, %s1182_s14 }
  0xd9   : > { %436 = vrot.lane.b32.xlu2 %v431_v45, %s1182_s14  ;;  %426 = vrot.lane.b32.xlu1 %v1400_v57, %s1181_s9 }
  0xda   : > { %419 = vrot.lane.b32.xlu0 %v1400_v57, %s1185_s17 }
  0xe1   : > { %497 = vrot.lane.b32.xlu2 %v492_v46, %s1182_s14  ;;  %487 = vrot.lane.b32.xlu1 %v1408_v61, %s1181_s9 }
  0xe2   : > { %482 = vrot.lane.b32.xlu0 %v1408_v61, %s1185_s17 }
  0xe9   : > { %505 = vrot.lane.b32.xlu2 %v502_v47, %s1182_s14  ;;  %512 = vrot.lane.b32.xlu1 %v509_v1, %s1183_s15 }
  0xea   : > { %510 = vrot.lane.b32.xlu0 %v502_v47, %s1183_s15 }
  0xf1   : > { %531 = vrot.lane.b32.xlu2 %v528_v2, %s1182_s14  ;;  %529 = vrot.lane.b32.xlu1 %v1425_v3, %s1182_s14 }
  0xf2   : > { %517 = vrot.lane.b32.xlu0 %v509_v1, %s1184_s16 }
  0xf9   : > { %522 = vrot.lane.b32.xlu2 %v1425_v3, %s1181_s9  ;;  %570 = vrot.lane.b32.xlu1 %v391_v6, %s1183_s15 }
  0xfa   : > { %536 = vrot.lane.b32.xlu0 %v528_v2, %s1183_s15 }
 0x101   : > { %541 = vrot.lane.b32.xlu2 %v1437_v7, %s1185_s17  ;;  %563 = vrot.lane.b32.xlu1 %v390_v60, %s1182_s14 }
 0x102   : > { %546 = vrot.lane.b32.xlu0 %v1437_v7, %s1181_s9 }
 0x109   : > { %575 = vrot.lane.b32.xlu2 %v391_v6, %s1184_s16  ;;  %589 = vrot.lane.b32.xlu1 %v586_v8, %s1182_s14  ;;  %s976_s16 = sshll.u32 %s972_s8, 4  ;;  %s977_s16 = int_to_ptr.hbm [resolvable:$true] %s976_s16 }
 0x10a   : > { %568 = vrot.lane.b32.xlu0 %v390_v60, %s1183_s15  ;;  %s1130_s13 = sshra.s32 %s977_s16, 4  ;;  %s1131_s13 = int_to_ptr.hbm [resolvable:$true] %s1130_s13 }
 0x10b   : > { %p1137_p0 = scmp.lt.s32.totalorder %s1131_s13, %s1874_s7 }
 0x111   : > { %580 = vrot.lane.b32.xlu2 %v1447_v9, %s1181_s9  ;;  %556 = vrot.lane.b32.xlu1 %v551_v48, %s1182_s14  ;;  %s270_s9 = scalar_lea.vmem [#allocation4], %s269_s23 }
 0x112   : > { %587 = vrot.lane.b32.xlu0 %v1447_v9, %s1182_s14  ;;  %s974_s14 = sshll.u32 %s270_s9, 4  ;;  %s975_s14 = int_to_ptr.vmem [resolvable:$true] %s974_s14 }
 0x113   : > { %v400_v10 = vpop.permute.xlu2 %399 }
 0x114   : > { %403 = vst.msk [vmem:[#allocation2] sm:$0x1] %vm402_vm3, %v400_v10 }
 0x11a   : > { %594 = vrot.lane.b32.xlu0 %v586_v8, %s1183_s15 }
 0x11b   : > { %v446_v11 = vpop.permute.xlu2 %445 }
 0x11c   : > { %448 = vst.msk [vmem:[#allocation2 + $0x5] sm:$0x1] %vm443_vm6, %v446_v11 }
 0x11d   : > { %468 = vst.msk [vmem:[#allocation2 + $0x5] sm:$0x1] %vm402_vm3, %v462_v54 }
 0x123   : > { %v459_v16 = vpop.permute.xlu2 %458 }
 0x124   : > { %461 = vst.msk [vmem:[#allocation2 + $0x7] sm:$0x1] %vm443_vm6, %v459_v16 }
 0x12b   : > { %v407_v20 = vpop.permute.xlu1 %406  ;;  %v478_v21 = vpop.permute.xlu2 %477 }
 0x12c   : > { %v415_v22 = vpop.permute.xlu0 %414  ;;  %480 = vst.msk [vmem:[#allocation2 + $0x7] sm:$0x1] %vm402_vm3, %v478_v21 }
 0x12d   : > { %417 = vst.msk [vmem:[#allocation2 + $0x3] sm:$0x1] %vm402_vm3, %v415_v22  ;;  %v825_v22 = vld [vmem:[%s1872_s5 + $0xc0] sm:$0xff] }
 0x133   : > { %v409_v27 = vpop.permute.xlu1 %408  ;;  %v437_v28 = vpop.permute.xlu2 %436 }
 0x134   : > { %v411_v29 = vsel %vm410_vm12, %v407_v20, %v409_v27  ;;  %439 = vst.msk [vmem:[#allocation2 + $0x3] sm:$0x1] %vm422_vm13, %v437_v28  ;;  %v451_v30 = vpop.permute.xlu0 %450 }
 0x135   : > { %413 = vst.msk [vmem:[#allocation2 + $0x2] sm:$0x1] %vm402_vm3, %v411_v29 }
 0x136   : > { %434 = vst.msk [vmem:[#allocation2 + $0x2] sm:$0x1] %vm422_vm13, %v1400_v57 }
 0x137   : > { %440 = vst.msk [vmem:[#allocation2 + $0xb] sm:$0x1] %vm424_vm7, %v437_v28 }
 0x13b   : > { %v473_v37 = vpop.permute.xlu1 %472  ;;  %v498_v38 = vpop.permute.xlu2 %497 }
 0x13c   : > { %500 = vst.msk [vmem:[#allocation2 + $0x7] sm:$0x1] %vm422_vm13, %v498_v38  ;;  %v453_v39 = vpop.permute.xlu0 %452 }
 0x13d   : > { %501 = vst.msk [vmem:[#allocation2 + $0xf] sm:$0x1] %vm424_vm7, %v498_v38  ;;  %v455_v41 = vsel %vm454_vm14, %v451_v30, %v453_v39 }
 0x13e   : > { %457 = vst.msk [vmem:[#allocation2 + $0x6] sm:$0x1] %vm443_vm6, %v455_v41 }
 0x143   : > { %v464_v42 = vpop.permute.xlu1 %463  ;;  %v506_v43 = vpop.permute.xlu2 %505 }
 0x144   : > { %466 = vst.msk [vmem:[#allocation2 + $0x4] sm:$0x1] %vm402_vm3, %v464_v42  ;;  %v471_v44 = vpop.permute.xlu0 %470 }
 0x145   : > { %508 = vst.msk [vmem:[#allocation2 + $0x11] sm:$0x1] %vm443_vm6, %v506_v43  ;;  %v474_v45 = vsel %vm410_vm12, %v471_v44, %v473_v37 }
 0x146   : > { %527 = vst.msk [vmem:[#allocation2 + $0x11] sm:$0x1] %vm402_vm3, %v1425_v3 }
 0x147   : > { %476 = vst.msk [vmem:[#allocation2 + $0x6] sm:$0x1] %vm402_vm3, %v474_v45 }
 0x148   : > { %495 = vst.msk [vmem:[#allocation2 + $0x6] sm:$0x1] %vm422_vm13, %v1408_v61 }
 0x14b   : > { %v532_v46 = vpop.permute.xlu2 %531  ;;  %v427_v47 = vpop.permute.xlu1 %426 }
 0x14c   : > { %429 = vst.msk [vmem:[#allocation2 + $0x1] sm:$0x1] %vm422_vm13, %v427_v47  ;;  %v420_v48 = vpop.permute.xlu0 %419 }
 0x14d   : > { %430 = vst.msk [vmem:[#allocation2 + $0x9] sm:$0x1] %vm424_vm7, %v427_v47  ;;  %v865_v47 = vld [vmem:[%s1873_s6] sm:$0x1] }
 0x14e   : > { %423 = vst.msk [vmem:[#allocation2] sm:$0x1] %vm422_vm13, %v420_v48 }
 0x14f   : > { %425 = vst.msk [vmem:[#allocation2 + $0x8] sm:$0x1] %vm424_vm7, %v420_v48 }
 0x153   : > { %v523_v49 = vpop.permute.xlu2 %522  ;;  %v488_v50 = vpop.permute.xlu1 %487 }
 0x154   : > { %525 = vst.msk [vmem:[#allocation2 + $0x10] sm:$0x1] %vm402_vm3, %v523_v49  ;;  %v483_v51 = vpop.permute.xlu0 %482 }
 0x155   : > { %490 = vst.msk [vmem:[#allocation2 + $0x5] sm:$0x1] %vm422_vm13, %v488_v50 }
 0x156   : > { %491 = vst.msk [vmem:[#allocation2 + $0xd] sm:$0x1] %vm424_vm7, %v488_v50 }
 0x157   : > { %485 = vst.msk [vmem:[#allocation2 + $0x4] sm:$0x1] %vm422_vm13, %v483_v51 }
 0x158   : > { %486 = vst.msk [vmem:[#allocation2 + $0xc] sm:$0x1] %vm424_vm7, %v483_v51 }
 0x15b   : > { %v542_v52 = vpop.permute.xlu2 %541  ;;  %v513_v53 = vpop.permute.xlu1 %512 }
 0x15c   : > { %544 = vst.msk [vmem:[#allocation2 + $0x10] sm:$0x1] %vm422_vm13, %v542_v52  ;;  %v511_v54 = vpop.permute.xlu0 %510 }
 0x15d   : > { %545 = vst.msk [vmem:[#allocation2 + $0x18] sm:$0x1] %vm424_vm7, %v542_v52  ;;  %v514_v55 = vsel %vm454_vm14, %v511_v54, %v513_v53 }
 0x15e   : > { %516 = vst.msk [vmem:[#allocation2 + $0x12] sm:$0x1] %vm443_vm6, %v514_v55  ;;  %v598_v56 = vld [vmem:[#allocation2] sm:$0xff]  ;;  %v816_v55 = vld [vmem:[%s1872_s5 + $0x78] sm:$0xff] }
 0x15f   : > { %647 = vmatmul.f32.vlgmr.msra.gmra.mxu2 %v598_v56  ;;  %v599_v57 = vld [vmem:[#allocation2 + $0x8] sm:$0xff]  ;;  %v832_v56 = vld [vmem:[%s1872_s5 + $0xf8] sm:$0xff]  ;;  %875 = vmatpush.msrb.mxu3 %v816_v55  ;;  %v834_v55 = vld [vmem:[%s1872_s5 + $0x108] sm:$0xff] }
 0x160   : > { %1047 = vmatmul.msk.f32.vlgmr.msra.gmra.mxu3 %vm624_vm15, %v599_v57  ;;  %v848_v57 = vld [vmem:[%s1872_s5 + $0x178] sm:$0xff]  ;;  %895 = vmatpush.msrb.mxu0 %v832_v56  ;;  %v850_v56 = vld [vmem:[%s1872_s5 + $0x188] sm:$0xff] }
 0x161   : > { %915 = vmatpush.msrb.mxu1 %v848_v57 }
 0x163   : > { %v576_v58 = vpop.permute.xlu2 %575  ;;  %v530_v59 = vpop.permute.xlu1 %529 }
 0x164   : > { %578 = vst.msk [vmem:[#allocation2 + $0x17] sm:$0x1] %vm443_vm6, %v576_v58  ;;  %v533_v60 = vsel %vm410_vm12, %v530_v59, %v532_v46  ;;  %v518_v61 = vpop.permute.xlu0 %517  ;;  %v864_v58 = vld [vmem:[%s1872_s5 + $0x1f8] sm:$0xff]  ;;  %v815_v59 = vld [vmem:[%s1872_s5 + $0x70] sm:$0xff] }
 0x165   : > { %535 = vst.msk [vmem:[#allocation2 + $0x12] sm:$0x1] %vm402_vm3, %v533_v60  ;;  %v831_v60 = vld [vmem:[%s1872_s5 + $0xf0] sm:$0xff]  ;;  %935 = vmatpush.msrb.mxu2 %v864_v58  ;;  %876 = vmatpush.msrb.mxu3 %v815_v59  ;;  %v801_v58 = vld [vmem:[%s1872_s5] sm:$0xff] }
 0x166   : > { %554 = vst.msk [vmem:[#allocation2 + $0x12] sm:$0x1] %vm422_vm13, %v1437_v7  ;;  %896 = vmatpush.msrb.mxu0 %v831_v60  ;;  %v817_v59 = vld [vmem:[%s1872_s5 + $0x80] sm:$0xff] }
 0x167   : > { %520 = vst.msk [vmem:[#allocation2 + $0x13] sm:$0x1] %vm443_vm6, %v518_v61  ;;  %v847_v61 = vld [vmem:[%s1872_s5 + $0x170] sm:$0xff]  ;;  %v833_v60 = vld [vmem:[%s1872_s5 + $0x100] sm:$0xff] }
 0x168   : > { %916 = vmatpush.msrb.mxu1 %v847_v61  ;;  %v849_v61 = vld [vmem:[%s1872_s5 + $0x180] sm:$0xff] }
 0x16b   : > { %v581_v62 = vpop.permute.xlu2 %580  ;;  %v571_v63 = vpop.permute.xlu1 %570 }
 0x16c   : > { %583 = vst.msk [vmem:[#allocation2 + $0x14] sm:$0x1] %vm402_vm3, %v581_v62  ;;  %v537_v0 = vpop.permute.xlu0 %536  ;;  %v863_v62 = vld [vmem:[%s1872_s5 + $0x1f0] sm:$0xff] }
 0x16d   : > { %539 = vst.msk [vmem:[#allocation2 + $0x13] sm:$0x1] %vm402_vm3, %v537_v0  ;;  %v830_v0 = vld [vmem:[%s1872_s5 + $0xe8] sm:$0xff]  ;;  %936 = vmatpush.msrb.mxu2 %v863_v62 }
 0x16e   : > { %897 = vmatpush.msrb.mxu0 %v830_v0 }
 0x173   : > { %v564_v1 = vpop.permute.xlu1 %563 }
 0x174   : > { %566 = vst.msk [vmem:[#allocation2 + $0x15] sm:$0x1] %vm443_vm6, %v564_v1  ;;  %v547_v2 = vpop.permute.xlu0 %546  ;;  %v846_v1 = vld [vmem:[%s1872_s5 + $0x168] sm:$0xff] }
 0x175   : > { %585 = vst.msk [vmem:[#allocation2 + $0x15] sm:$0x1] %vm402_vm3, %v1447_v9  ;;  %917 = vmatpush.msrb.mxu1 %v846_v1 }
 0x176   : > { %549 = vst.msk [vmem:[#allocation2 + $0x11] sm:$0x1] %vm422_vm13, %v547_v2 }
 0x177   : > { %550 = vst.msk [vmem:[#allocation2 + $0x19] sm:$0x1] %vm424_vm7, %v547_v2  ;;  %v862_v2 = vld [vmem:[%s1872_s5 + $0x1e8] sm:$0xff] }
 0x178   : > { %937 = vmatpush.msrb.mxu2 %v862_v2 }
 0x17b   : > { %v590_v3 = vpop.permute.xlu1 %589 }
 0x17c   : > { %v569_v4 = vpop.permute.xlu0 %568 }
 0x17d   : > { %v572_v5 = vsel %vm454_vm14, %v569_v4, %v571_v63  ;;  %v814_v63 = vld [vmem:[%s1872_s5 + $0x68] sm:$0xff]  ;;  %v813_v4 = vld [vmem:[%s1872_s5 + $0x60] sm:$0xff] }
 0x17e   : > { %574 = vst.msk [vmem:[#allocation2 + $0x16] sm:$0x1] %vm443_vm6, %v572_v5  ;;  %vm712_vm6 = vcmp.lt.s32.totalorder %v689_v19, 96  ;;  %877 = vmatpush.msrb.mxu3 %v814_v63  ;;  %v829_v5 = vld [vmem:[%s1872_s5 + $0xe0] sm:$0xff] }
 0x17f   : > { %vm1606_vm8 = vmand %vm711_vm5, %vm712_vm6  ;;  %898 = vmatpush.msrb.mxu0 %v829_v5 }
 0x180   : > { %878 = vmatpush.msrb.mxu3 %v813_v4 }
 0x183   : > { %v557_v6 = vpop.permute.xlu1 %556 }
 0x184   : > { %559 = vst.msk [vmem:[#allocation2 + $0x13] sm:$0x1] %vm422_vm13, %v557_v6  ;;  %v588_v7 = vpop.permute.xlu0 %587 }
 0x185   : > { %560 = vst.msk [vmem:[#allocation2 + $0x1b] sm:$0x1] %vm424_vm7, %v557_v6  ;;  %v591_v8 = vsel %vm410_vm12, %v588_v7, %v590_v3  ;;  %v845_v6 = vld [vmem:[%s1872_s5 + $0x160] sm:$0xff]  ;;  %vm961_vm12 = vcmask 253952  }
 0x186   : > { %593 = vst.msk [vmem:[#allocation2 + $0x16] sm:$0x1] %vm402_vm3, %v591_v8  ;;  %v861_v7 = vld [vmem:[%s1872_s5 + $0x1e0] sm:$0xff]  ;;  %v812_v8 = vld [vmem:[%s1872_s5 + $0x58] sm:$0xff]  ;;  %918 = vmatpush.msrb.mxu1 %v845_v6 }
 0x187   : > { %938 = vmatpush.msrb.mxu2 %v861_v7  ;;  %879 = vmatpush.msrb.mxu3 %v812_v8 }
 0x18c   : > { %v595_v9 = vpop.permute.xlu0 %594  ;;  %v601_v10 = vld [vmem:[#allocation2 + $0x18] sm:$0xff] }
 0x18d   : > { %597 = vst.msk [vmem:[#allocation2 + $0x17] sm:$0x1] %vm402_vm3, %v595_v9  ;;  %1048 = vmatmul.msk.f32.gmra.mxu3 %vm624_vm15, %v601_v10  ;;  %vm701_vm3 = vcmp.ge.s32.totalorder %v689_v19, 32  ;;  %v828_v9 = vld [vmem:[%s1872_s5 + $0xd8] sm:$0xff]  ;;  %v858_v19 = vld [vmem:[%s1872_s5 + $0x1c8] sm:$0xff] }
 0x18e   : > { %vm1602_vm7 = vmand %vm701_vm3, %vm702_vm4  ;;  %v844_v10 = vld [vmem:[%s1872_s5 + $0x158] sm:$0xff]  ;;  %899 = vmatpush.msrb.mxu0 %v828_v9 }
 0x18f   : > { %919 = vmatpush.msrb.mxu1 %v844_v10 }
 0x194   : > { %v600_v11 = vld [vmem:[#allocation2 + $0x10] sm:$0xff] }
 0x195   : > { %650 = vmatmul.f32.gmra.mxu2 %v600_v11  ;;  %v860_v11 = vld [vmem:[%s1872_s5 + $0x1d8] sm:$0xff] }
 0x196   : > { %939 = vmatpush.msrb.mxu2 %v860_v11 }
 0x1e2   : > { %v648_v13 = vpop.f32.mrf.mxu2 }
 0x1e3   : > { %v649_v14 = vadd.f32 %v1101_v12, %v648_v13  ;;  %v671_v15 = vpop.f32.mrf.mxu3  ;;  %v827_v13 = vld [vmem:[%s1872_s5 + $0xd0] sm:$0xff] }
 0x1e4   : > { %900 = vmatpush.msrb.mxu0 %v827_v13 }
 0x1e5   : > { %v672_v16 = vadd.f32 %v671_v15, %v649_v14  ;;  %v843_v14 = vld [vmem:[%s1872_s5 + $0x150] sm:$0xff] }
 0x1e6   : > { %v859_v15 = vld [vmem:[%s1872_s5 + $0x1d0] sm:$0xff]  ;;  %920 = vmatpush.msrb.mxu1 %v843_v14 }
 0x1e7   : > { %v679_v17 = vmin.f32 %v672_v16, 0.0  ;;  %vm677_vm0 = vcmp.gt.f32.partialorder %v672_v16, 0.0  ;;  %940 = vmatpush.msrb.mxu2 %v859_v15 }
 0x1e9   : > { %v681_v18 = vmul.f32 1.442695, %v679_v17  ;;  %v826_v17 = vld [vmem:[%s1872_s5 + $0xc8] sm:$0xff]  ;;  %941 = vmatpush.msrb.mxu2 %v858_v19 }
 0x1ea   : > { %901 = vmatpush.msrb.mxu0 %v826_v17 }
 0x1eb   : > { %1110 = vpow2.f32 %v681_v18  ;;  %v842_v18 = vld [vmem:[%s1872_s5 + $0x148] sm:$0xff] }
 0x1ec   : > { %921 = vmatpush.msrb.mxu1 %v842_v18  ;;  %902 = vmatpush.msrb.mxu0 %v825_v22 }
 0x1f1   : > { %v1111_v20 = vpop.eup %1110 }
 0x1f2   : > { %v1049_v21 = vadd.f32 -1.0, %v1111_v20 }
 0x1f4   : > { %v687_v23 = vsel %vm677_vm0, %v672_v16, %v1049_v21  ;;  %v810_v16 = vld [vmem:[%s1872_s5 + $0x48] sm:$0xff]  ;;  %v809_v21 = vld [vmem:[%s1872_s5 + $0x40] sm:$0xff] }
 0x1f5   : > { %695 = vst [vmem:[#allocation1] sm:$0xff] %v687_v23 }
 0x1f6   : > { %693 = vst.msk [vmem:[#allocation3] sm:$0x1] %vm1574_vm1, %v687_v23 }
 0x1fc   : > { %v697_v24 = vld [vmem:[#allocation1 + $0x1] ss:$9 sm:$0xff] }
 0x1fd   : > { %705 = vst [vmem:[#allocation1] sm:$0xff] %v687_v23  ;;  %698 = vrot.lane.b32.xlu1 %v697_v24, %s1183_s15  ;;  %v857_v24 = vld [vmem:[%s1872_s5 + $0x1c0] sm:$0xff] }
 0x1fe   : > { %942 = vmatpush.msrb.mxu2 %v857_v24 }
 0x204   : > { %v707_v25 = vld [vmem:[#allocation1 + $0x2] ss:$9 sm:$0xff] }
 0x205   : > { %715 = vst [vmem:[#allocation1] sm:$0xff] %v687_v23  ;;  %708 = vrot.lane.b32.xlu2 %v707_v25, %s1186_s19  ;;  %v808_v25 = vld [vmem:[%s1872_s5 + $0x38] sm:$0xff] }
 0x20c   : > { %v717_v26 = vld [vmem:[#allocation1 + $0x3] ss:$9 sm:$0xff] }
 0x20d   : > { %725 = vst [vmem:[#allocation1] sm:$0xff] %v687_v23  ;;  %718 = vrot.lane.b32.xlu0 %v717_v26, %s1185_s17  ;;  %v824_v26 = vld [vmem:[%s1872_s5 + $0xb8] sm:$0xff] }
 0x20e   : > { %903 = vmatpush.msrb.mxu0 %v824_v26 }
 0x210   : > { %v674_v30 = vpop.f32.mrf.mxu3 }
 0x214   : > { %v727_v27 = vld [vmem:[#allocation1 + $0x4] ss:$9 sm:$0xff] }
 0x215   : > { %730 = vst [vmem:[#allocation1] sm:$0xff] %v687_v23 }
 0x216   : > { %729 = vst.msk [vmem:[#allocation3 + $0x1] sm:$0x1] %vm1574_vm1, %v727_v27  ;;  %v840_v27 = vld [vmem:[%s1872_s5 + $0x138] sm:$0xff] }
 0x218   : > { %v651_v28 = vpop.f32.mrf.mxu2 }
 0x219   : > { %v652_v29 = vadd.f32 %v1101_v12, %v651_v28  ;;  %v811_v12 = vld [vmem:[%s1872_s5 + $0x50] sm:$0xff]  ;;  %v856_v28 = vld [vmem:[%s1872_s5 + $0x1b8] sm:$0xff] }
 0x21a   : > { %880 = vmatpush.msrb.mxu3 %v811_v12  ;;  %943 = vmatpush.msrb.mxu2 %v856_v28 }
 0x21b   : > { %v675_v31 = vadd.f32 %v674_v30, %v652_v29  ;;  %v807_v29 = vld [vmem:[%s1872_s5 + $0x30] sm:$0xff] }
 0x21c   : > { %v732_v32 = vld [vmem:[#allocation1 + $0x5] ss:$9 sm:$0xff]  ;;  %881 = vmatpush.msrb.mxu3 %v810_v16 }
 0x21d   : > { %737 = vst [vmem:[#allocation1] sm:$0xff] %v687_v23  ;;  %v680_v33 = vmin.f32 %v675_v31, 0.0  ;;  %733 = vrot.lane.b32.xlu2 %v732_v32, %s1183_s15  ;;  %vm678_vm2 = vcmp.gt.f32.partialorder %v675_v31, 0.0  ;;  %v823_v30 = vld [vmem:[%s1872_s5 + $0xb0] sm:$0xff] }
 0x21e   : > { %882 = vmatpush.msrb.mxu3 %v809_v21  ;;  %v855_v32 = vld [vmem:[%s1872_s5 + $0x1b0] sm:$0xff]  ;;  %904 = vmatpush.msrb.mxu0 %v823_v30 }
 0x21f   : > { %v683_v34 = vmul.f32 1.442695, %v680_v33  ;;  %v806_v33 = vld [vmem:[%s1872_s5 + $0x28] sm:$0xff]  ;;  %944 = vmatpush.msrb.mxu2 %v855_v32 }
 0x220   : > { %883 = vmatpush.msrb.mxu3 %v808_v25 }
 0x221   : > { %1112 = vpow2.f32 %v683_v34  ;;  %v822_v34 = vld [vmem:[%s1872_s5 + $0xa8] sm:$0xff] }
 0x222   : > { %884 = vmatpush.msrb.mxu3 %v807_v29  ;;  %905 = vmatpush.msrb.mxu0 %v822_v34 }
 0x224   : > { %v739_v35 = vld [vmem:[#allocation1 + $0x6] ss:$9 sm:$0xff]  ;;  %885 = vmatpush.msrb.mxu3 %v806_v33 }
 0x225   : > { %740 = vrot.lane.b32.xlu0 %v739_v35, %s1186_s19  ;;  %744 = vst [vmem:[#allocation1] sm:$0xff] %v687_v23  ;;  %v841_v23 = vld [vmem:[%s1872_s5 + $0x140] sm:$0xff]  ;;  %v838_v35 = vld [vmem:[%s1872_s5 + $0x128] sm:$0xff] }
 0x226   : > { %922 = vmatpush.msrb.mxu1 %v841_v23 }
 0x227   : > { %v1113_v36 = vpop.eup %1112 }
 0x228   : > { %v1050_v37 = vadd.f32 -1.0, %v1113_v36  ;;  %923 = vmatpush.msrb.mxu1 %v840_v27  ;;  %v854_v36 = vld [vmem:[%s1872_s5 + $0x1a8] sm:$0xff] }
 0x229   : > { %945 = vmatpush.msrb.mxu2 %v854_v36 }
 0x22a   : > { %v688_v38 = vsel %vm678_vm2, %v675_v31, %v1050_v37  ;;  %v839_v31 = vld [vmem:[%s1872_s5 + $0x130] sm:$0xff] }
 0x22b   : > { %751 = vst.msk [vmem:[#allocation3 + $0x2] sm:$0x1] %vm1574_vm1, %v688_v38  ;;  %924 = vmatpush.msrb.mxu1 %v839_v31 }
 0x22c   : > { %v746_v39 = vld [vmem:[#allocation1 + $0x7] ss:$9 sm:$0xff] }
 0x22d   : > { %753 = vst [vmem:[#allocation1] sm:$0xff] %v688_v38  ;;  %925 = vmatpush.msrb.mxu1 %v838_v35 }
 0x234   : > { %v755_v40 = vld [vmem:[#allocation1 + $0x1] ss:$9 sm:$0xff] }
 0x235   : > { %756 = vrot.lane.b32.xlu0 %v755_v40, %s1183_s15  ;;  %760 = vst [vmem:[#allocation1] sm:$0xff] %v688_v38  ;;  %v837_v40 = vld [vmem:[%s1872_s5 + $0x120] sm:$0xff] }
 0x236   : > { %926 = vmatpush.msrb.mxu1 %v837_v40 }
 0x23c   : > { %v762_v41 = vld [vmem:[#allocation1 + $0x2] ss:$9 sm:$0xff] }
 0x23d   : > { %763 = vrot.lane.b32.xlu1 %v762_v41, %s1186_s19  ;;  %767 = vst [vmem:[#allocation1] sm:$0xff] %v688_v38  ;;  %v853_v41 = vld [vmem:[%s1872_s5 + $0x1a0] sm:$0xff] }
 0x23e   : > { %946 = vmatpush.msrb.mxu2 %v853_v41 }
 0x244   : > { %v769_v42 = vld [vmem:[#allocation1 + $0x3] ss:$9 sm:$0xff] }
 0x245   : > { %774 = vst [vmem:[#allocation1] sm:$0xff] %v688_v38 }
 0x24c   : > { %v776_v43 = vld [vmem:[#allocation1 + $0x4] ss:$9 sm:$0xff] }
 0x24d   : > { %779 = vst [vmem:[#allocation1] sm:$0xff] %v688_v38 }
 0x24e   : > { %778 = vst.msk [vmem:[#allocation3 + $0x3] sm:$0x1] %vm1574_vm1, %v776_v43  ;;  %v820_v43 = vld [vmem:[%s1872_s5 + $0x98] sm:$0xff] }
 0x254   : > { %v781_v44 = vld [vmem:[#allocation1 + $0x5] ss:$9 sm:$0xff] }
 0x255   : > { %782 = vrot.lane.b32.xlu1 %v781_v44, %s1183_s15  ;;  %786 = vst [vmem:[#allocation1] sm:$0xff] %v688_v38  ;;  %v836_v44 = vld [vmem:[%s1872_s5 + $0x118] sm:$0xff] }
 0x256   : > { %927 = vmatpush.msrb.mxu1 %v836_v44 }
 0x25c   : > { %v788_v45 = vld [vmem:[#allocation1 + $0x6] ss:$9 sm:$0xff] }
 0x25d   : > { %747 = vrot.lane.b32.xlu1 %v746_v39, %s1185_s17  ;;  %789 = vrot.lane.b32.xlu2 %v788_v45, %s1186_s19  ;;  %793 = vst [vmem:[#allocation1] sm:$0xff] %v688_v38  ;;  %v805_v38 = vld [vmem:[%s1872_s5 + $0x20] sm:$0xff]  ;;  %v852_v45 = vld [vmem:[%s1872_s5 + $0x198] sm:$0xff]  ;;  %s1132_s19 = scalar_lea.hbm %s1131_s13, 1 }
 0x25e   : > { %v821_v39 = vld [vmem:[%s1872_s5 + $0xa0] sm:$0xff]  ;;  %886 = vmatpush.msrb.mxu3 %v805_v38  ;;  %947 = vmatpush.msrb.mxu2 %v852_v45  ;;  %p1133_p11 = scmp.ne.s32.totalorder %s1131_s13, %s1132_s19 }
 0x25f   : > { %v709_v49 = vpop.permute.xlu2 %708  ;;  %906 = vmatpush.msrb.mxu0 %v821_v39 }
 0x260   : > { %p1134_p12 = pnand %p1133_p11, %p1265_p5 }
 0x261   : > { %907 = vmatpush.msrb.mxu0 %v820_v43 }
 0x262   : > { %p1135_p13 = pneg %p1134_p12 }
 0x264   : > { %v795_v46 = vld [vmem:[#allocation1 + $0x7] ss:$9 sm:$0xff] }
 0x265   : > { %770 = vrot.lane.b32.xlu2 %v769_v42, %s1185_s17  ;;  %796 = vrot.lane.b32.xlu0 %v795_v46, %s1185_s17  ;;  %v804_v42 = vld [vmem:[%s1872_s5 + $0x18] sm:$0xff]  ;;  %v803_v46 = vld [vmem:[%s1872_s5 + $0x10] sm:$0xff]  ;;  %s1136_s17 = scalar_lea.hbm %s1874_s7, 2 }
 0x266   : > { %887 = vmatpush.msrb.mxu3 %v804_v42  ;;  %p1138_p1 = scmp.lt.s32.totalorder %s1136_s17, %s1132_s19 }
 0x268   : > { %888 = vmatpush.msrb.mxu3 %v803_v46  ;;  %p1139_p2 = por %p1138_p1, %p1137_p0 }
 0x26a   : > { %p1140_p3 = pnand %p1139_p2, %p1135_p13 }
 0x26f   : > { %v699_v50 = vpop.permute.xlu1 %698 }
 0x270   : > { %704 = vst.msk [vmem:[#allocation3] sm:$0x1] %vm1602_vm7, %v699_v50  ;;  %v835_v50 = vld [vmem:[%s1872_s5 + $0x110] sm:$0xff] }
 0x271   : > { %714 = vst.msk [vmem:[#allocation3] sm:$0x1] %vm1606_vm8, %v709_v49  ;;  %v819_v49 = vld [vmem:[%s1872_s5 + $0x90] sm:$0xff]  ;;  %928 = vmatpush.msrb.mxu1 %v835_v50 }
 0x272   : > { %908 = vmatpush.msrb.mxu0 %v819_v49 }
 0x273   : > { %929 = vmatpush.msrb.mxu1 %v834_v55 }
 0x275   : > { %930 = vmatpush.msrb.mxu1 %v833_v60 }
 0x277   : > { %v734_v51 = vpop.permute.xlu2 %733 }
 0x278   : > { %736 = vst.msk [vmem:[#allocation3 + $0x1] sm:$0x1] %vm1602_vm7, %v734_v51  ;;  %v851_v51 = vld [vmem:[%s1872_s5 + $0x190] sm:$0xff] }
 0x279   : > { %948 = vmatpush.msrb.mxu2 %v851_v51 }
 0x27b   : > { %949 = vmatpush.msrb.mxu2 %v850_v56 }
 0x27d   : > { %950 = vmatpush.msrb.mxu2 %v849_v61 }
 0x27f   : > { %v719_v53 = vpop.permute.xlu0 %718 }
 0x280   : > { %724 = vst.msk [vmem:[#allocation3] sm:$0x1] %vm1618_vm11, %v719_v53  ;;  %v802_v53 = vld [vmem:[%s1872_s5 + $0x8] sm:$0xff] }
 0x281   : > { %889 = vmatpush.msrb.mxu3 %v802_v53 }
 0x283   : > { %890 = vmatpush.msrb.mxu3 %v801_v58 }
 0x297   : > { %v741_v54 = vpop.permute.xlu0 %740 }
 0x298   : > { %743 = vst.msk [vmem:[#allocation3 + $0x1] sm:$0x1] %vm1606_vm8, %v741_v54  ;;  %v818_v54 = vld [vmem:[%s1872_s5 + $0x88] sm:$0xff] }
 0x299   : > { %909 = vmatpush.msrb.mxu0 %v818_v54 }
 0x29b   : > { %910 = vmatpush.msrb.mxu0 %v817_v59 }
 0x2a7   : > { %v757_v3 = vpop.permute.xlu0 %756 }
 0x2a8   : > { %759 = vst.msk [vmem:[#allocation3 + $0x2] sm:$0x1] %vm1602_vm7, %v757_v3 }
 0x2af   : > { %v764_v20 = vpop.permute.xlu1 %763 }
 0x2b0   : > { %766 = vst.msk [vmem:[#allocation3 + $0x2] sm:$0x1] %vm1606_vm8, %v764_v20 }
 0x2b7   : > { %v790_v37 = vpop.permute.xlu2 %789 }
 0x2bf   : > { %v771_v57 = vpop.permute.xlu2 %770 }
 0x2c0   : > { %773 = vst.msk [vmem:[#allocation3 + $0x2] sm:$0x1] %vm1618_vm11, %v771_v57 }
 0x2c7   : > { %v783_v62 = vpop.permute.xlu1 %782 }
 0x2c8   : > { %785 = vst.msk [vmem:[#allocation3 + $0x3] sm:$0x1] %vm1602_vm7, %v783_v62 }
 0x2c9   : > { %792 = vst.msk [vmem:[#allocation3 + $0x3] sm:$0x1] %vm1606_vm8, %v790_v37 }
 0x2cf   : > { %v748_v63 = vpop.permute.xlu1 %747 }
 0x2d0   : > { %750 = vst.msk [vmem:[#allocation3 + $0x1] sm:$0x1] %vm1618_vm11, %v748_v63 }
 0x2d7   : > { %v797_v0 = vpop.permute.xlu0 %796 }
 0x2d8   : > { %799 = vst.msk [vmem:[#allocation3 + $0x3] sm:$0x1] %vm1618_vm11, %v797_v0 }
 0x2df   : > { %v800_v1 = vld [vmem:[#allocation3] sm:$0xf] }
 0x2e0   : > { %v867_v2 = vperm.slane %v800_v1, 0  ;;  %v868_v3 = vperm.slane %v800_v1, 1  ;;  %v869_v4 = vperm.slane %v800_v1, 2  ;;  %v870_v5 = vperm.slane %v800_v1, 3 }
 0x2e2   : > { %891 = vmatmul.f32.vlgmr.msrb.gmra.mxu3 %v867_v2  ;;  %911 = vmatmul.f32.vlgmr.msrb.gmra.mxu0 %v868_v3 }
 0x2e3   : > { %931 = vmatmul.f32.vlgmr.msrb.gmra.mxu1 %v869_v4  ;;  %951 = vmatmul.f32.vlgmr.msrb.gmra.mxu2 %v870_v5 }
 0x35f   : > { %v912_v7 = vpop.f32.mrf.mxu0 }
 0x360   : > { %v932_v8 = vpop.f32.mrf.mxu1 }
 0x365   : > { %v892_v48 = vpop.f32.mrf.mxu3 }
 0x366   : > { %v893_v6 = vadd.f32 %v892_v48, %v865_v47  ;;  %v952_v10 = vpop.f32.mrf.mxu2 }
 0x368   : > { %v913_v52 = vadd.f32 %v912_v7, %v893_v6 }
 0x36a   : > { %v933_v9 = vadd.f32 %v932_v8, %v913_v52 }
 0x36c   : > { %v953_v11 = vadd.f32 %v952_v10, %v933_v9 }
 0x36e   : > { %v956_v12 = vmin.f32 %v953_v11, 0.0  ;;  %vm955_vm13 = vcmp.gt.f32.partialorder %v953_v11, 0.0 }
 0x370   : > { %v957_v13 = vmul.f32 1.442695, %v956_v12 }
 0x372   : > { %1114 = vpow2.f32 %v957_v13 }
 0x378   : > { %v1115_v14 = vpop.eup %1114 }
 0x379   : > { %v1051_v15 = vadd.f32 -1.0, %v1115_v14 }
 0x37b   : > { %v960_v16 = vsel %vm955_vm13, %v953_v11, %v1051_v15 }
 0x37c   : > { %962 = vst.msk [vmem:[%s270_s9] sm:$0x1] %vm961_vm12, %v960_v16 }
 0x37d   : > { %1143 = shalt.err (!%p1140_p3)
}
 0x37e   : > { %1055 = dma.vmem_to_hbm [thread:$0]  (%p1265_p5), %s975_s14, 16, %s977_s16, %s964_s18  }
 0x37f PF: > { %p1061_p4 = scmp.ge.s32.totalorder %s1178_s27, 2  ;;  %s988_s23 = sand.u32 1, %s1166_s24  }
 0x380   : > { %s989_s29 = scalar_lea.sflag [#allocation5], %s988_s23 }
 0x381   : > { %p1058_p7 = pnand %p1061_p4, %p1269_p6 }
 0x383   : > { %p1059_p8 = pneg %p1058_p7 }
 0x385   : > { %1161 = dma.done.wait (%p1059_p8), %s989_s29, 16  }
 0x386   : > { %1163 = vsyncadd (%p1059_p8), %s989_s29, 4294967280  ;;  %p17_p9 = scmp.ge.s32.totalorder %s1252_s30, 4   ;;  %s1885_s24 = smov %s1170_s25 }
 0x387   : > { %s1886_s25 = smov %s1174_s26  ;;  %s1887_s26 = smov %s1263_s10 }
 0x388   : > { %s1888_s27 = smov %s1252_s30  ;;  %19 = sbr.rel (!%p17_p9) target bundleno = 3 (0x3), region = 97 }
 0x38d   :  { %994 = vsyncpa [#allocation5], 1 }
 0x38e   :  { %996 = vsyncpa [#allocation5 + $0x1], 1 }

</bundles_post_ra>
